<compile_context>
chip_gen: v7x
topology: tpu7x:2x2x1
jax: 0.10.0
libtpu: 0.0.40
codegen_flags: <defaults>
</compile_context>

<pallas_src>
import functools
import math

import jax
import jax.numpy as jnp
from jax.experimental import pallas as pl
from jax.experimental.pallas import tpu as pltpu


def _round_up(a, b):
    return (a + b - 1) // b * b


def _vmem_limit_bytes():
    try:
        cap = int(pltpu.get_tpu_info().vmem_capacity_bytes)
    except Exception:
        cap = 64 * 1024 * 1024          # conservative (v7x per-core VMEM)
    return min(int(cap * 0.6), 100 * 1024 * 1024)


# --------------------------------------------------------------------------- #
# Fused kernel: phase 0 = conv (MXU) + per-channel moments into resident VMEM,
#               phase 1 = z = alpha * y + beta streamed to HBM.
# --------------------------------------------------------------------------- #
def _fused_conv_tdbn_kernel(p_ref, w_ref, gb_ref, o_ref,
                            y_sc, sum_sc, sq_sc, coef_sc, *,
                            block_rows, r, c_out, inv_m, eps):
    phase = pl.program_id(0)
    i = pl.program_id(1)
    last = pl.num_programs(1) - 1

    @pl.when(jnp.logical_and(phase == 0, i == 0))
    def _init():
        sum_sc[...] = jnp.zeros_like(sum_sc)
        sq_sc[...] = jnp.zeros_like(sq_sc)

    @pl.when(phase == 0)
    def _conv_and_stats():
        # conv-as-matmul: bf16 operands, f32 accumulation on the MXU.
        y = jnp.dot(p_ref[...], w_ref[...], preferred_element_type=jnp.float32)
        sum_sc[...] += jnp.sum(y, axis=0, keepdims=True)
        sq_sc[...] += jnp.sum(y * y, axis=0, keepdims=True)
        off = pl.multiple_of(i * block_rows, block_rows)
        y_sc[pl.ds(off, block_rows), :] = y.astype(y_sc.dtype)   # stays in VMEM

    @pl.when(jnp.logical_and(phase == 0, i == last))
    def _finalize():
        s_l = sum_sc[...]                                  # (1, lanes)
        q_l = sq_sc[...]
        s = s_l[:, 0:c_out]
        q = q_l[:, 0:c_out]
        for rep in range(1, r):                            # combine lane replicas
            s = s + s_l[:, rep * c_out:(rep + 1) * c_out]
            q = q + q_l[:, rep * c_out:(rep + 1) * c_out]
        mean = s * inv_m
        var = jnp.maximum(q * inv_m - mean * mean, 0.0)    # biased batch variance
        alpha = gb_ref[0:1, :] * jax.lax.rsqrt(var + eps)
        beta = gb_ref[1:2, :] - alpha * mean
        coef_sc[0:1, :] = jnp.concatenate([alpha] * r, axis=1)
        coef_sc[1:2, :] = jnp.concatenate([beta] * r, axis=1)

    @pl.when(phase == 1)
    def _apply():
        off = pl.multiple_of(i * block_rows, block_rows)
        yb = y_sc[pl.ds(off, block_rows), :].astype(jnp.float32)
        o_ref[...] = (yb * coef_sc[0:1, :] + coef_sc[1:2, :]).astype(o_ref.dtype)


# --------------------------------------------------------------------------- #
# Two-pass fallback (large layers): pass 1 conv + stats, pass 2 affine apply.
# --------------------------------------------------------------------------- #
def _conv_stats_kernel(p_ref, w_ref, y_ref, sum_ref, sq_ref):
    @pl.when(pl.program_id(1) == 0)                        # per-core re-init
    def _init():
        sum_ref[...] = jnp.zeros_like(sum_ref)
        sq_ref[...] = jnp.zeros_like(sq_ref)
    y = jnp.dot(p_ref[...], w_ref[...], preferred_element_type=jnp.float32)
    sum_ref[...] += jnp.sum(y, axis=0, keepdims=True)[None]
    sq_ref[...] += jnp.sum(y * y, axis=0, keepdims=True)[None]
    y_ref[...] = y.astype(y_ref.dtype)


def _bn_apply_kernel(y_ref, coef_ref, o_ref):
    c = coef_ref[...]                                      # (2, lanes): [alpha; beta]
    o_ref[...] = (y_ref[...].astype(jnp.float32) * c[0:1, :] + c[1:2, :]).astype(o_ref.dtype)


# --------------------------------------------------------------------------- #
# Wrapper
# --------------------------------------------------------------------------- #
def tdbn_layer_forward(x_seq, conv_w, conv_b, bn_gamma, bn_beta, *,
                       stride=1, padding=1, eps=1e-5, block_rows=None,
                       compute_dtype=jnp.bfloat16, fuse=None):
    """x_seq: (T,N,C_in,H,W); conv_w: (C_out,C_in,KH,KW); conv_b/gamma/beta: (C_out,)."""
    T, N, C_in, H, W = x_seq.shape
    C_out, c_in_w, KH, KW = conv_w.shape
    assert c_in_w == C_in
    B = T * N
    Ho = (H + 2 * padding - KH) // stride + 1
    Wo = (W + 2 * padding - KW) // stride + 1
    M = B * Ho * Wo
    K = KH * KW * C_in
    out_dtype = x_seq.dtype

    # conv_b cancels exactly in training-mode BN (per-channel mean subtraction) --
    # accepted for API parity, not needed in the computation.
    del conv_b

    # ---- XLA glue: channels-last + pad + im2col, in bf16 (halves the dominant stream)
    # TODO(synk): replace im2col / layout transposes with halo'd BlockSpecs or manual
    # DMA that read x directly and build K in VMEM (removes the KH*KW x input blow-up).
    x = jnp.transpose(x_seq.reshape(B, C_in, H, W), (0, 2, 3, 1)).astype(compute_dtype)
    x = jnp.pad(x, ((0, 0), (padding, padding), (padding, padding), (0, 0)))
    cols = []
    for dh in range(KH):
        for dw in range(KW):
            cols.append(x[:, dh:dh + (Ho - 1) * stride + 1:stride,
                             dw:dw + (Wo - 1) * stride + 1:stride, :])
    patches = jnp.concatenate(cols, axis=-1).reshape(M, K)
    w_mat = jnp.transpose(conv_w, (2, 3, 1, 0)).reshape(K, C_out).astype(compute_dtype)

    # ---- lane packing: r patch rows per lane-row so blocks are 128-lane multiples.
    # Block-diagonal weight makes the MXU emit the packed layout directly (no in-kernel
    # relayout).  Extra r x MXU flops are hidden under the HBM bound at these K/C_out.
    r = 128 // math.gcd(C_out, 128)
    if r > 16:                                 # awkward C_out: skip packing
        r = 1
    lanes = r * C_out
    rK = r * K
    w_bd = jnp.kron(jnp.eye(r, dtype=compute_dtype), w_mat)          # (rK, lanes)

    rows = (M + r - 1) // r
    vmem_limit = _vmem_limit_bytes()

    # fused = keep the whole packed conv output resident in VMEM (no y HBM round-trip)
    y_resident_bytes = _round_up(rows, 16) * lanes * jnp.dtype(compute_dtype).itemsize
    if fuse is None:
        fuse = y_resident_bytes <= int(0.35 * vmem_limit)

    if block_rows is None:
        fixed = 2 * rK * lanes * 2 + (1 << 20)                       # w_bd bufs + slack
        if fuse:
            fixed += y_resident_bytes
        per_row = 4 * rK + 4 * lanes * max(2, jnp.dtype(out_dtype).itemsize)
        block_rows = max(16, min(4096, (vmem_limit - fixed) // max(per_row, 1)))
    block_rows = max(16, min(_round_up(block_rows, 16), _round_up(rows, 16)))

    cores_split = 1 if fuse else 2             # two-pass: megacore split of pass 1
    rows_pad = _round_up(rows, cores_split * block_rows)
    m_pad = rows_pad * r
    if m_pad != M:
        patches = jnp.pad(patches, ((0, m_pad - M), (0, 0)))
    pp = patches.reshape(rows_pad, rK)         # free, contiguous repack
    gb = jnp.stack([bn_gamma, bn_beta]).astype(jnp.float32)          # (2, C_out)

    inv_m = 1.0 / float(M)
    grid_n = rows_pad // block_rows

    if fuse:
        kernel = functools.partial(_fused_conv_tdbn_kernel, block_rows=block_rows,
                                   r=r, c_out=C_out, inv_m=inv_m, eps=eps)
        z2 = pl.pallas_call(
            kernel,
            out_shape=jax.ShapeDtypeStruct((rows_pad, lanes), out_dtype),
            grid=(2, grid_n),                  # phase 0: conv+stats, phase 1: apply
            in_specs=[pl.BlockSpec((block_rows, rK), lambda p, i: (i * (1 - p), 0)),
                      pl.BlockSpec((rK, lanes), lambda p, i: (0, 0)),
                      pl.BlockSpec((2, C_out), lambda p, i: (0, 0))],
            out_specs=pl.BlockSpec((block_rows, lanes), lambda p, i: (i * p, 0)),
            scratch_shapes=[pltpu.VMEM((rows_pad, lanes), compute_dtype),   # resident y
                            pltpu.VMEM((1, lanes), jnp.float32),            # sum
                            pltpu.VMEM((1, lanes), jnp.float32),            # sum of sq
                            pltpu.VMEM((2, lanes), jnp.float32)],           # alpha/beta
            compiler_params=pltpu.CompilerParams(
                dimension_semantics=("arbitrary", "arbitrary"),
                vmem_limit_bytes=vmem_limit),
        )(pp, w_bd, gb)
    else:
        half = grid_n // 2
        y, sums, sqs = pl.pallas_call(
            _conv_stats_kernel,
            out_shape=(jax.ShapeDtypeStruct((rows_pad, lanes), compute_dtype),
                       jax.ShapeDtypeStruct((2, 1, lanes), jnp.float32),
                       jax.ShapeDtypeStruct((2, 1, lanes), jnp.float32)),
            grid=(2, half),
            in_specs=[pl.BlockSpec((block_rows, rK), lambda c, i: (c * half + i, 0)),
                      pl.BlockSpec((rK, lanes), lambda c, i: (0, 0))],
            out_specs=(pl.BlockSpec((block_rows, lanes), lambda c, i: (c * half + i, 0)),
                       pl.BlockSpec((1, 1, lanes), lambda c, i: (c, 0, 0)),
                       pl.BlockSpec((1, 1, lanes), lambda c, i: (c, 0, 0))),
            compiler_params=pltpu.CompilerParams(
                dimension_semantics=("parallel", "arbitrary"),
                vmem_limit_bytes=vmem_limit),
        )(pp, w_bd)

        # finalize: fuse BN into a per-channel affine (2*C_out scalars)
        s_c = sums.sum(axis=(0, 1)).reshape(r, C_out).sum(axis=0)
        q_c = sqs.sum(axis=(0, 1)).reshape(r, C_out).sum(axis=0)
        mean = s_c * inv_m
        var = jnp.maximum(q_c * inv_m - mean * mean, 0.0)
        alpha = bn_gamma.astype(jnp.float32) * jax.lax.rsqrt(var + eps)
        beta = bn_beta.astype(jnp.float32) - alpha * mean
        coef = jnp.stack([jnp.tile(alpha, r), jnp.tile(beta, r)])    # (2, lanes)

        z2 = pl.pallas_call(
            _bn_apply_kernel,
            out_shape=jax.ShapeDtypeStruct((rows_pad, lanes), out_dtype),
            grid=(grid_n,),
            in_specs=[pl.BlockSpec((block_rows, lanes), lambda i: (i, 0)),
                      pl.BlockSpec((2, lanes), lambda i: (0, 0))],
            out_specs=pl.BlockSpec((block_rows, lanes), lambda i: (i, 0)),
            compiler_params=pltpu.CompilerParams(
                dimension_semantics=("parallel",),
                vmem_limit_bytes=vmem_limit),
        )(y, coef)

    # ---- back to PyTorch layout (T, N, C_out, H', W') -----------------------
    z = z2.reshape(m_pad, C_out)[:M].reshape(B, Ho, Wo, C_out)
    return jnp.transpose(z, (0, 3, 1, 2)).reshape(T, N, C_out, Ho, Wo)


# --------------------------------------------------------------------------- #
# Pure-JAX reference of the PyTorch forward
# --------------------------------------------------------------------------- #
def tdbn_layer_reference(x_seq, conv_w, conv_b, bn_gamma, bn_beta, *,
                         stride=1, padding=1, eps=1e-5, compute_dtype=jnp.float32):
    T, N, C_in, H, W = x_seq.shape
    C_out = conv_w.shape[0]
    xb = x_seq.reshape(T * N, C_in, H, W).astype(compute_dtype).astype(jnp.float32)
    wf = conv_w.astype(compute_dtype).astype(jnp.float32)
    y = jax.lax.conv_general_dilated(
        xb, wf, window_strides=(stride, stride),
        padding=((padding, padding), (padding, padding)),
        dimension_numbers=("NCHW", "OIHW", "NCHW"),
        precision=jax.lax.Precision.HIGHEST)
    y = y + conv_b.reshape(1, -1, 1, 1).astype(jnp.float32)
    Ho, Wo = y.shape[2], y.shape[3]
    y5 = y.reshape(T, N, C_out, Ho, Wo)
    m = jnp.mean(y5, axis=(0, 1, 3, 4), keepdims=True)
    v = jnp.mean((y5 - m) ** 2, axis=(0, 1, 3, 4), keepdims=True)
    return ((y5 - m) * jax.lax.rsqrt(v + eps) * bn_gamma.reshape(1, 1, -1, 1, 1)
            + bn_beta.reshape(1, 1, -1, 1, 1))


if __name__ == "__main__":
    key = jax.random.PRNGKey(0)
    kx, kw, kb, kg, kbt = jax.random.split(key, 5)

    # seq T=4, batch N=2, C_in=8 -> C_out=32, 3x3 conv, stride=1, pad=1, 14x14 spatial
    T, N, C_in, C_out, H, W = 4, 2, 8, 32, 14, 14
    x_seq = jax.random.normal(kx, (T, N, C_in, H, W), dtype=jnp.float32)
    conv_w = 0.1 * jax.random.normal(kw, (C_out, C_in, 3, 3), dtype=jnp.float32)
    conv_b = 0.1 * jax.random.normal(kb, (C_out,), dtype=jnp.float32)
    bn_gamma = 1.0 + 0.1 * jax.random.normal(kg, (C_out,), dtype=jnp.float32)
    bn_beta = 0.1 * jax.random.normal(kbt, (C_out,), dtype=jnp.float32)

    args = (x_seq, conv_w, conv_b, bn_gamma, bn_beta)
    ref_f32 = jax.block_until_ready(tdbn_layer_reference(*args))
    ref_bf16 = jax.block_until_ready(
        tdbn_layer_reference(*args, compute_dtype=jnp.bfloat16))

    cases = {
        # default: auto tile sizing + fused single-call path
        "fused/auto": tdbn_layer_forward(*args),
        # small tiles force a multi-step grid (exercises resident y / stats scratch)
        "fused/block64": tdbn_layer_forward(*args, block_rows=64, fuse=True),
        # two-pass fallback path (megacore-split stats + lane-dense apply)
        "two-pass/block64": tdbn_layer_forward(*args, block_rows=64, fuse=False),
    }

    for name, out in cases.items():
        out = jax.block_until_ready(out)
        assert out.shape == (T, N, C_out, H, W), (name, out.shape)
        # tight check against a precision-matched (bf16-input) reference
        err_b = float(jnp.max(jnp.abs(out - ref_bf16)))
        assert jnp.allclose(out, ref_bf16, atol=1e-2, rtol=1e-2), \
            f"{name}: mismatch vs bf16-input reference, max|err|={err_b}"
        # looser check against the exact f32 module semantics (bf16 MXU inputs)
        err_f = float(jnp.max(jnp.abs(out - ref_f32)))
        assert jnp.allclose(out, ref_f32, atol=5e-2, rtol=5e-2), \
            f"{name}: mismatch vs f32 reference, max|err|={err_f}"

    print("KERNEL_OK")
</pallas_src>

<mosaic_0001>
module attributes {stable_mosaic.version = 11 : i64} {
  func.func @_fused_conv_tdbn_kernel(%arg0: i32, %arg1: i32, %arg2: memref<400x288xbf16, #tpu.memory_space<vmem>>, %arg3: memref<288x128xbf16, #tpu.memory_space<vmem>>, %arg4: memref<2x32xf32, #tpu.memory_space<vmem>>, %arg5: memref<400x128xf32, #tpu.memory_space<vmem>>, %arg6: memref<400x128xbf16, #tpu.memory_space<vmem>>, %arg7: memref<1x128xf32, #tpu.memory_space<vmem>>, %arg8: memref<1x128xf32, #tpu.memory_space<vmem>>, %arg9: memref<2x128xf32, #tpu.memory_space<vmem>>) attributes {dimension_semantics = [#tpu.dimension_semantics<arbitrary>, #tpu.dimension_semantics<arbitrary>], iteration_bounds = array<i64: 2, 1>, scalar_prefetch = 0 : i64, scratch_operands = 4 : i64, tpu.core_type = #tpu.core_type<tc>, window_params = [{transform_indices = @transform_0, window_bounds = array<i64: 400, 288>}, {pipeline_mode = #tpu.pipeline_mode<synchronous>, transform_indices = @transform_1, window_bounds = array<i64: 288, 128>}, {pipeline_mode = #tpu.pipeline_mode<synchronous>, transform_indices = @transform_2, window_bounds = array<i64: 2, 32>}, {transform_indices = @transform_3, window_bounds = array<i64: 400, 128>}]} {
    %c0_i32 = arith.constant 0 : i32
    %0 = arith.cmpi eq, %arg0, %c0_i32 : i32
    %c0_i32_0 = arith.constant 0 : i32
    %1 = arith.cmpi eq, %arg1, %c0_i32_0 : i32
    %2 = arith.andi %0, %1 : i1
    %3 = arith.extui %2 : i1 to i32
    %c0_i32_1 = arith.constant 0 : i32
    %4 = arith.cmpi ne, %3, %c0_i32_1 : i32
    scf.if %4 {
      %cst = arith.constant 0.000000e+00 : f32
      %16 = vector.broadcast %cst : f32 to vector<1x128xf32>
      %c0 = arith.constant 0 : index
      %c0_8 = arith.constant 0 : index
      %17 = vector.load %arg7[%c0, %c0_8] : memref<1x128xf32, #tpu.memory_space<vmem>>, vector<1x128xf32>
      tpu.vector_store %arg7[%c0, %c0_8], %16 {strides = array<i32>} : memref<1x128xf32, #tpu.memory_space<vmem>>, vector<1x128xf32>,
      %cst_9 = arith.constant 0.000000e+00 : f32
      %18 = vector.broadcast %cst_9 : f32 to vector<1x128xf32>
      %c0_10 = arith.constant 0 : index
      %c0_11 = arith.constant 0 : index
      %19 = vector.load %arg8[%c0_10, %c0_11] : memref<1x128xf32, #tpu.memory_space<vmem>>, vector<1x128xf32>
      tpu.vector_store %arg8[%c0_10, %c0_11], %18 {strides = array<i32>} : memref<1x128xf32, #tpu.memory_space<vmem>>, vector<1x128xf32>,
    } else {
    }
    %c0_i32_2 = arith.constant 0 : i32
    %5 = arith.cmpi eq, %arg0, %c0_i32_2 : i32
    %6 = arith.extui %5 : i1 to i32
    %c0_i32_3 = arith.constant 0 : i32
    %7 = arith.cmpi ne, %6, %c0_i32_3 : i32
    scf.if %7 {
      %c0 = arith.constant 0 : index
      %c0_8 = arith.constant 0 : index
      %16 = vector.load %arg2[%c0, %c0_8] : memref<400x288xbf16, #tpu.memory_space<vmem>>, vector<400x288xbf16>
      %c0_9 = arith.constant 0 : index
      %c0_10 = arith.constant 0 : index
      %17 = vector.load %arg3[%c0_9, %c0_10] : memref<288x128xbf16, #tpu.memory_space<vmem>>, vector<288x128xbf16>
      %cst = arith.constant dense<0.000000e+00> : vector<400x128xf32>
      %18 = tpu.matmul %16, %17, %cst {dimension_numbers = #tpu.dot_dimension_numbers<[1], [0], [0], [1], [0, 0, 1, 1], [], []>} : vector<400x288xbf16>, vector<288x128xbf16>, vector<400x128xf32> -> vector<400x128xf32>
      %c0_11 = arith.constant 0 : index
      %c0_12 = arith.constant 0 : index
      %19 = vector.load %arg7[%c0_11, %c0_12] : memref<1x128xf32, #tpu.memory_space<vmem>>, vector<1x128xf32>
      %cst_13 = arith.constant dense<0.000000e+00> : vector<128xf32>
      %20 = vector.multi_reduction <add>, %18, %cst_13 [0] : vector<400x128xf32> to vector<128xf32>
      %21 = vector.shape_cast %20 : vector<128xf32> to vector<1x128xf32>
      %22 = arith.addf %19, %21 : vector<1x128xf32>
      %c0_14 = arith.constant 0 : index
      %c0_15 = arith.constant 0 : index
      %23 = vector.load %arg7[%c0_14, %c0_15] : memref<1x128xf32, #tpu.memory_space<vmem>>, vector<1x128xf32>
      tpu.vector_store %arg7[%c0_14, %c0_15], %22 {strides = array<i32>} : memref<1x128xf32, #tpu.memory_space<vmem>>, vector<1x128xf32>,
      %c0_16 = arith.constant 0 : index
      %c0_17 = arith.constant 0 : index
      %24 = vector.load %arg8[%c0_16, %c0_17] : memref<1x128xf32, #tpu.memory_space<vmem>>, vector<1x128xf32>
      %25 = arith.mulf %18, %18 : vector<400x128xf32>
      %cst_18 = arith.constant dense<0.000000e+00> : vector<128xf32>
      %26 = vector.multi_reduction <add>, %25, %cst_18 [0] : vector<400x128xf32> to vector<128xf32>
      %27 = vector.shape_cast %26 : vector<128xf32> to vector<1x128xf32>
      %28 = arith.addf %24, %27 : vector<1x128xf32>
      %c0_19 = arith.constant 0 : index
      %c0_20 = arith.constant 0 : index
      %29 = vector.load %arg8[%c0_19, %c0_20] : memref<1x128xf32, #tpu.memory_space<vmem>>, vector<1x128xf32>
      tpu.vector_store %arg8[%c0_19, %c0_20], %28 {strides = array<i32>} : memref<1x128xf32, #tpu.memory_space<vmem>>, vector<1x128xf32>,
      %c400_i32 = arith.constant 400 : i32
      %30 = arith.muli %arg1, %c400_i32 : i32
      %31 = tpu.assume_multiple %30, 400 : i32
      %32 = arith.truncf %18 : vector<400x128xf32> to vector<400x128xbf16>
      %33 = arith.index_cast %31 : i32 to index
      %c0_21 = arith.constant 0 : index
      %34 = vector.load %arg6[%33, %c0_21] : memref<400x128xbf16, #tpu.memory_space<vmem>>, vector<400x128xbf16>
      tpu.vector_store %arg6[%33, %c0_21], %32 {strides = array<i32>} : memref<400x128xbf16, #tpu.memory_space<vmem>>, vector<400x128xbf16>,
    } else {
    }
    %c0_i32_4 = arith.constant 0 : i32
    %8 = arith.cmpi eq, %arg0, %c0_i32_4 : i32
    %c0_i32_5 = arith.constant 0 : i32
    %9 = arith.cmpi eq, %arg1, %c0_i32_5 : i32
    %10 = arith.andi %8, %9 : i1
    %11 = arith.extui %10 : i1 to i32
    %c0_i32_6 = arith.constant 0 : i32
    %12 = arith.cmpi ne, %11, %c0_i32_6 : i32
    scf.if %12 {
      %c0 = arith.constant 0 : index
      %c0_8 = arith.constant 0 : index
      %16 = vector.load %arg7[%c0, %c0_8] : memref<1x128xf32, #tpu.memory_space<vmem>>, vector<1x128xf32>
      %c0_9 = arith.constant 0 : index
      %c0_10 = arith.constant 0 : index
      %17 = vector.load %arg8[%c0_9, %c0_10] : memref<1x128xf32, #tpu.memory_space<vmem>>, vector<1x128xf32>
      %18 = vector.extract_strided_slice %16 {offsets = [0, 0], sizes = [1, 32], strides = [1, 1]} : vector<1x128xf32> to vector<1x32xf32>
      %19 = vector.extract_strided_slice %17 {offsets = [0, 0], sizes = [1, 32], strides = [1, 1]} : vector<1x128xf32> to vector<1x32xf32>
      %20 = vector.extract_strided_slice %16 {offsets = [0, 32], sizes = [1, 32], strides = [1, 1]} : vector<1x128xf32> to vector<1x32xf32>
      %21 = arith.addf %18, %20 : vector<1x32xf32>
      %22 = vector.extract_strided_slice %17 {offsets = [0, 32], sizes = [1, 32], strides = [1, 1]} : vector<1x128xf32> to vector<1x32xf32>
      %23 = arith.addf %19, %22 : vector<1x32xf32>
      %24 = vector.extract_strided_slice %16 {offsets = [0, 64], sizes = [1, 32], strides = [1, 1]} : vector<1x128xf32> to vector<1x32xf32>
      %25 = arith.addf %21, %24 : vector<1x32xf32>
      %26 = vector.extract_strided_slice %17 {offsets = [0, 64], sizes = [1, 32], strides = [1, 1]} : vector<1x128xf32> to vector<1x32xf32>
      %27 = arith.addf %23, %26 : vector<1x32xf32>
      %28 = vector.extract_strided_slice %16 {offsets = [0, 96], sizes = [1, 32], strides = [1, 1]} : vector<1x128xf32> to vector<1x32xf32>
      %29 = arith.addf %25, %28 : vector<1x32xf32>
      %30 = vector.extract_strided_slice %17 {offsets = [0, 96], sizes = [1, 32], strides = [1, 1]} : vector<1x128xf32> to vector<1x32xf32>
      %31 = arith.addf %27, %30 : vector<1x32xf32>
      %cst = arith.constant 6.37755089E-4 : f32
      %32 = vector.broadcast %cst : f32 to vector<1x32xf32>
      %33 = arith.mulf %29, %32 : vector<1x32xf32>
      %cst_11 = arith.constant 6.37755089E-4 : f32
      %34 = vector.broadcast %cst_11 : f32 to vector<1x32xf32>
      %35 = arith.mulf %31, %34 : vector<1x32xf32>
      %36 = arith.mulf %33, %33 : vector<1x32xf32>
      %37 = arith.subf %35, %36 : vector<1x32xf32>
      %cst_12 = arith.constant 0.000000e+00 : f32
      %38 = vector.broadcast %cst_12 : f32 to vector<1x32xf32>
      %39 = arith.maximumf %37, %38 : vector<1x32xf32>
      %c0_13 = arith.constant 0 : index
      %c0_14 = arith.constant 0 : index
      %40 = vector.load %arg4[%c0_13, %c0_14] : memref<2x32xf32, #tpu.memory_space<vmem>>, vector<1x32xf32>
      %cst_15 = arith.constant 9.99999974E-6 : f32
      %41 = vector.broadcast %cst_15 : f32 to vector<1x32xf32>
      %42 = arith.addf %39, %41 : vector<1x32xf32>
      %43 = math.rsqrt %42 : vector<1x32xf32>
      %44 = arith.mulf %40, %43 : vector<1x32xf32>
      %c1 = arith.constant 1 : index
      %c0_16 = arith.constant 0 : index
      %45 = vector.load %arg4[%c1, %c0_16] : memref<2x32xf32, #tpu.memory_space<vmem>>, vector<1x32xf32>
      %46 = arith.mulf %44, %33 : vector<1x32xf32>
      %47 = arith.subf %45, %46 : vector<1x32xf32>
      %48 = tpu.concatenate %44, %44, %44, %44 in 1 : vector<1x32xf32>, vector<1x32xf32>, vector<1x32xf32>, vector<1x32xf32> -> vector<1x128xf32>
      %c0_17 = arith.constant 0 : index
      %c0_18 = arith.constant 0 : index
      %49 = vector.load %arg9[%c0_17, %c0_18] : memref<2x128xf32, #tpu.memory_space<vmem>>, vector<1x128xf32>
      tpu.vector_store %arg9[%c0_17, %c0_18], %48 {strides = array<i32>} : memref<2x128xf32, #tpu.memory_space<vmem>>, vector<1x128xf32>,
      %50 = tpu.concatenate %47, %47, %47, %47 in 1 : vector<1x32xf32>, vector<1x32xf32>, vector<1x32xf32>, vector<1x32xf32> -> vector<1x128xf32>
      %c1_19 = arith.constant 1 : index
      %c0_20 = arith.constant 0 : index
      %51 = vector.load %arg9[%c1_19, %c0_20] : memref<2x128xf32, #tpu.memory_space<vmem>>, vector<1x128xf32>
      tpu.vector_store %arg9[%c1_19, %c0_20], %50 {strides = array<i32>} : memref<2x128xf32, #tpu.memory_space<vmem>>, vector<1x128xf32>,
    } else {
    }
    %c1_i32 = arith.constant 1 : i32
    %13 = arith.cmpi eq, %arg0, %c1_i32 : i32
    %14 = arith.extui %13 : i1 to i32
    %c0_i32_7 = arith.constant 0 : i32
    %15 = arith.cmpi ne, %14, %c0_i32_7 : i32
    scf.if %15 {
      %c400_i32 = arith.constant 400 : i32
      %16 = arith.muli %arg1, %c400_i32 : i32
      %17 = tpu.assume_multiple %16, 400 : i32
      %18 = arith.index_cast %17 : i32 to index
      %c0 = arith.constant 0 : index
      %19 = vector.load %arg6[%18, %c0] : memref<400x128xbf16, #tpu.memory_space<vmem>>, vector<400x128xbf16>
      %20 = arith.extf %19 : vector<400x128xbf16> to vector<400x128xf32>
      %c0_8 = arith.constant 0 : index
      %c0_9 = arith.constant 0 : index
      %21 = vector.load %arg9[%c0_8, %c0_9] : memref<2x128xf32, #tpu.memory_space<vmem>>, vector<1x128xf32>
      %22 = vector.broadcast %21 : vector<1x128xf32> to vector<400x128xf32>
      %23 = arith.mulf %20, %22 : vector<400x128xf32>
      %c1 = arith.constant 1 : index
      %c0_10 = arith.constant 0 : index
      %24 = vector.load %arg9[%c1, %c0_10] : memref<2x128xf32, #tpu.memory_space<vmem>>, vector<1x128xf32>
      %25 = vector.broadcast %24 : vector<1x128xf32> to vector<400x128xf32>
      %26 = arith.addf %23, %25 : vector<400x128xf32>
      %c0_11 = arith.constant 0 : index
      %c0_12 = arith.constant 0 : index
      %27 = vector.load %arg5[%c0_11, %c0_12] : memref<400x128xf32, #tpu.memory_space<vmem>>, vector<400x128xf32>
      tpu.vector_store %arg5[%c0_11, %c0_12], %26 {strides = array<i32>} : memref<400x128xf32, #tpu.memory_space<vmem>>, vector<400x128xf32>,
    } else {
    }
    return
  }
  func.func @transform_0(%arg0: i32, %arg1: i32) -> (i32, i32) {
    %c1_i32 = arith.constant 1 : i32
    %0 = arith.subi %c1_i32, %arg0 : i32
    %1 = arith.muli %arg1, %0 : i32
    %c0_i32 = arith.constant 0 : i32
    %c0_i32_0 = arith.constant 0 : i32
    return %1, %c0_i32 : i32, i32
  }
  func.func @transform_1(%arg0: i32, %arg1: i32) -> (i32, i32) {
    %c0_i32 = arith.constant 0 : i32
    %c0_i32_0 = arith.constant 0 : i32
    %c0_i32_1 = arith.constant 0 : i32
    return %c0_i32, %c0_i32_0 : i32, i32
  }
  func.func @transform_2(%arg0: i32, %arg1: i32) -> (i32, i32) {
    %c0_i32 = arith.constant 0 : i32
    %c0_i32_0 = arith.constant 0 : i32
    %c0_i32_1 = arith.constant 0 : i32
    return %c0_i32, %c0_i32_0 : i32, i32
  }
  func.func @transform_3(%arg0: i32, %arg1: i32) -> (i32, i32) {
    %0 = arith.muli %arg1, %arg0 : i32
    %c0_i32 = arith.constant 0 : i32
    %c0_i32_0 = arith.constant 0 : i32
    return %0, %c0_i32 : i32, i32
  }
}

</mosaic_0001>

<bundles_post_ra>
// kernel: tpu_custom_call.1
= control target key start
LH: loop header
LB: loop body
LE: loop exit
PB: predicated region body
PF: predicated region fallthrough
CT: control target
= control target key end

     0   :  { %8 = vsyncpa [#allocation7], 0  ;;  %s3259_s0 = inlined_call_operand.vmem [shape: bf16[400,288], index: 0, kind: input, shape index: {}]   ;;  %s3260_s1 = inlined_call_operand.vmem [shape: bf16[288,128], index: 1, kind: input, shape index: {}]   ;;  %s3261_s2 = inlined_call_operand.vmem [shape: f32[2,32], index: 2, kind: input, shape index: {}]   ;;  %s3262_s3 = inlined_call_operand.hbm [shape: f32[400,128], index: 3, kind: output, shape index: {}]  }
   0x1   :  { %10 = vsyncpa [#allocation7 + $0x1], 0  ;;  %s2568_s12 = smov 0   ;;  %s2570_s13 = smov 0  }
   0x2   :  { %s2572_s14 = smov 0  }
   0x3 LB: > { %s2004_s15 = sadd.s32 4294967295, %s2536_s14   ;;  %s2005_s16 = sadd.s32 4294967294, %s2536_s14   ;;  %s2536_s14 = sphi %s2572_s14, %s16_s14   ;;  %s2532_s13 = sphi %s2570_s13, %s3265_s13   ;;  %s2528_s12 = sphi %s2568_s12, %s3264_s12  }
   0x4   : > { %s28_s17 = sadd.s32 1, %s2532_s13  ;;  %p2009_p0 = scmp.ge.s32.totalorder %s2536_s14, 1 }
   0x5   : > { %p30_p1 = scmp.ge.s32.totalorder %s28_s17, 2  ;;  %p164_p2 = scmp.lt.s32.totalorder %s2536_s14, 3 }
   0x7   : > { %s3267_s17 = smov (%p30_p1, %s28_s17), 0  ;;  %p165_p3 = pnand %p2009_p0, %p164_p2 }
   0x8   : > { %p205_p4 = scmp.eq.s32.totalorder (!%p165_p3), %s2528_s12, 0 }
   0x9   : > { %168 = sbr.rel (%p165_p3) target bundleno = 866 (0x362), region = 32 }
  0x10   : > { %210 = sbr.rel (!%p205_p4) target bundleno = 23 (0x17), region = 36  ;;  %v2538_v0 = vmov (%p205_p4), 0.0  }
  0x11   : > { %211 = vst [vmem:[#allocation3] sm:$0x1] (%p205_p4), %v2538_v0  ;;  %212 = vst [vmem:[#allocation4] sm:$0x1] (%p205_p4), %v2538_v0 }
  0x17 PF: > { %p2011_p5 = scmp.ne.s32.totalorder %s2528_s12, 0 }
  0x18   : > { %v2364_v1 = vld [vmem:[%s3260_s1] sm:$0xff] (!%p2011_p5)   ;;  %v2539_v2 = vmov (!%p2011_p5), 0   ;;  %v2365_v3 = vld [vmem:[%s3260_s1 + $0x8] sm:$0xff] (!%p2011_p5)   ;;  %v2540_v4 = vmov (!%p2011_p5), 0.0   ;;  %vm2541_vm0 = vmmov (!%p2011_p5), 0   ;;  %v2366_v5 = vld [vmem:[%s3260_s1 + $0x10] sm:$0xff] (!%p2011_p5)  }
  0x19   : > { %215 = sbr.rel (%p2011_p5) target bundleno = 516 (0x204), region = 40  ;;  %911 = vmatprep.subr.bf16.mxu1 (!%p2011_p5), %v2539_v2  ;;  %2165 = vmatprep.subr.bf16.mxu0 (!%p2011_p5), %v2540_v4  ;;  %v2367_v6 = vld [vmem:[%s3260_s1 + $0x18] sm:$0xff] (!%p2011_p5)   ;;  %v2368_v7 = vld [vmem:[%s3260_s1 + $0x20] sm:$0xff] (!%p2011_p5)   ;;  %v2380_v9 = vld [vmem:[%s3260_s1 + $0x88] sm:$0xff] (!%p2011_p5)   ;;  %vm835_vm1 = vcmask (!%p2011_p5), 261120  }
  0x1a   : > { %912 = vmatpush1.bf16.msra.mxu1 (!%p2011_p5), %v2364_v1  ;;  %2169 = vmatprep.mubr.msk.bf16.mxu0 (!%p2011_p5), %vm2541_vm0, %v2540_v4  ;;  %v2378_v8 = vld [vmem:[%s3260_s1 + $0x80] sm:$0xff] (!%p2011_p5)   ;;  %v2369_v10 = vld [vmem:[%s3260_s1 + $0x28] sm:$0xff] (!%p2011_p5)   ;;  %v2370_v13 = vld [vmem:[%s3260_s1 + $0x30] sm:$0xff] (!%p2011_p5)  }
  0x1b   : > { %913 = vmatprep.subr.bf16.mxu1 (!%p2011_p5), %v2539_v2  ;;  %2166 = vmatpush3.bf16.msra.mxu0 (!%p2011_p5), %v2378_v8  ;;  %v2382_v11 = vld [vmem:[%s3259_s0 + $0x8] ss:$12 sps:$4 sm:$0xff] (!%p2011_p5)   ;;  %v2385_v12 = vld [vmem:[%s3259_s0 + $0x4] ss:$12 sps:$4 sm:$0xff] (!%p2011_p5)   ;;  %v2371_v14 = vld [vmem:[%s3260_s1 + $0x38] sm:$0xff] (!%p2011_p5)  }
  0x1c   : > { %2167 = vmatprep.subr.bf16.mxu0 (!%p2011_p5), %v2540_v4  ;;  %943 = vmatprep.mubr.bf16.mxu1 (!%p2011_p5), %v2385_v12  ;;  %v2386_v15 = vld [vmem:[%s3259_s0 + $0x20] ss:$12 sps:$4 sm:$0xff] (!%p2011_p5)   ;;  %v2390_v18 = vld [vmem:[%s3259_s0 + $0x38] ss:$12 sps:$4 sm:$0xff] (!%p2011_p5)   ;;  %v2374_v19 = vld [vmem:[%s3260_s1 + $0x50] sm:$0xff] (!%p2011_p5)  }
  0x1d   : > { %v2372_v16 = vld [vmem:[%s3260_s1 + $0x40] sm:$0xff] (!%p2011_p5)   ;;  %v2373_v17 = vld [vmem:[%s3260_s1 + $0x48] sm:$0xff] (!%p2011_p5)   ;;  %v2375_v20 = vld [vmem:[%s3260_s1 + $0x58] sm:$0xff] (!%p2011_p5)  }
  0x1e   : > { %914 = vmatpush1.bf16.msra.mxu1 (!%p2011_p5), %v2365_v3  ;;  %v2394_v21 = vld [vmem:[%s3259_s0 + $0x50] ss:$12 sps:$4 sm:$0xff] (!%p2011_p5)   ;;  %v2376_v22 = vld [vmem:[%s3260_s1 + $0x60] sm:$0xff] (!%p2011_p5)   ;;  %v2377_v23 = vld [vmem:[%s3260_s1 + $0x68] sm:$0xff] (!%p2011_p5)  }
  0x1f   : > { %915 = vmatprep.subr.bf16.mxu1 (!%p2011_p5), %v2539_v2  ;;  %2168 = vmatpush3.bf16.msra.mxu0 (!%p2011_p5), %v2380_v9  ;;  %v2398_v24 = vld [vmem:[%s3259_s0 + $0x68] ss:$12 sps:$4 sm:$0xff] (!%p2011_p5)   ;;  %v2381_v26 = vld [vmem:[%s3260_s1 + $0x78] sm:$0xff] (!%p2011_p5)   ;;  %v2402_v27 = vld [vmem:[%s3259_s0 + $0x80] ss:$12 sps:$4 sm:$0xff] (!%p2011_p5)  }
  0x20   : > { %v2379_v25 = vld [vmem:[%s3260_s1 + $0x70] sm:$0xff]   ;;  %v2383_v28 = vld [vmem:[%s3259_s0] ss:$12 sps:$4 sm:$0xff]   ;;  %v2387_v29 = vld [vmem:[%s3259_s0 + $0x1c] ss:$12 sps:$4 sm:$0xff]  }
  0x21   : > { %v2406_v30 = vld [vmem:[%s3259_s0 + $0x98] ss:$12 sps:$4 sm:$0xff]   ;;  %v2391_v32 = vld [vmem:[%s3259_s0 + $0x34] ss:$12 sps:$4 sm:$0xff]   ;;  %v2410_v33 = vld [vmem:[%s3259_s0 + $0xb0] ss:$12 sps:$4 sm:$0xff]  }
  0x22   : > { %916 = vmatpush1.bf16.msra.mxu1 %v2366_v5  ;;  %2170 = vmatmul.mubr.msk.bf16.vlgmr.msra.gmra.mrb[0].mxu0 %vm835_vm1, %v2382_v11  ;;  %v2389_v31 = vld [vmem:[%s3259_s0 + $0x18] ss:$12 sps:$4 sm:$0xff]   ;;  %v2393_v34 = vld [vmem:[%s3259_s0 + $0x30] ss:$12 sps:$4 sm:$0xff]   ;;  %v2414_v36 = vld [vmem:[%s3259_s0 + $0xc8] ss:$12 sps:$4 sm:$0xff]  }
  0x23   : > { %917 = vmatprep.subr.bf16.mxu1 %v2539_v2  ;;  %2173 = vmatprep.mubr.msk.bf16.mxu0 %vm2541_vm0, %v2540_v4  ;;  %v2395_v35 = vld [vmem:[%s3259_s0 + $0x4c] ss:$12 sps:$4 sm:$0xff]   ;;  %v2397_v37 = vld [vmem:[%s3259_s0 + $0x48] ss:$12 sps:$4 sm:$0xff]   ;;  %v2399_v38 = vld [vmem:[%s3259_s0 + $0x64] ss:$12 sps:$4 sm:$0xff]  }
  0x24   : > { %v2418_v39 = vld [vmem:[%s3259_s0 + $0xe0] ss:$12 sps:$4 sm:$0xff]   ;;  %v2403_v41 = vld [vmem:[%s3259_s0 + $0x7c] ss:$12 sps:$4 sm:$0xff]   ;;  %v2422_v42 = vld [vmem:[%s3259_s0 + $0xf8] ss:$12 sps:$4 sm:$0xff]  }
  0x25   : > { %v2401_v40 = vld [vmem:[%s3259_s0 + $0x60] ss:$12 sps:$4 sm:$0xff]   ;;  %v2405_v43 = vld [vmem:[%s3259_s0 + $0x78] ss:$12 sps:$4 sm:$0xff]   ;;  %v2426_v45 = vld [vmem:[%s3259_s0 + $0x110] ss:$12 sps:$4 sm:$0xff]  }
  0x26   : > { %918 = vmatpush1.bf16.msra.mxu1 %v2367_v6  ;;  %v2407_v44 = vld [vmem:[%s3259_s0 + $0x94] ss:$12 sps:$4 sm:$0xff]   ;;  %v2409_v46 = vld [vmem:[%s3259_s0 + $0x90] ss:$12 sps:$4 sm:$0xff]   ;;  %v2411_v47 = vld [vmem:[%s3259_s0 + $0xac] ss:$12 sps:$4 sm:$0xff]  }
  0x27   : > { %919 = vmatprep.subr.bf16.mxu1 %v2539_v2  ;;  %v2430_v48 = vld [vmem:[%s3259_s0 + $0x128] ss:$12 sps:$4 sm:$0xff]   ;;  %v2415_v50 = vld [vmem:[%s3259_s0 + $0xc4] ss:$12 sps:$4 sm:$0xff]   ;;  %v2434_v51 = vld [vmem:[%s3259_s0 + $0x140] ss:$12 sps:$4 sm:$0xff]  }
  0x28   : > { %v2413_v49 = vld [vmem:[%s3259_s0 + $0xa8] ss:$12 sps:$4 sm:$0xff]   ;;  %v2417_v52 = vld [vmem:[%s3259_s0 + $0xc0] ss:$12 sps:$4 sm:$0xff]   ;;  %v2438_v54 = vld [vmem:[%s3259_s0 + $0x158] ss:$12 sps:$4 sm:$0xff]  }
  0x29   : > { %v2419_v53 = vld [vmem:[%s3259_s0 + $0xdc] ss:$12 sps:$4 sm:$0xff]   ;;  %v2421_v55 = vld [vmem:[%s3259_s0 + $0xd8] ss:$12 sps:$4 sm:$0xff]   ;;  %v2423_v56 = vld [vmem:[%s3259_s0 + $0xf4] ss:$12 sps:$4 sm:$0xff]  }
  0x2a   : > { %920 = vmatpush1.bf16.msra.mxu1 %v2368_v7  ;;  %2174 = vmatmul.mubr.msk.bf16.gmra.mrb[4].mxu0 %vm835_vm1, %v2386_v15  ;;  %v2442_v57 = vld [vmem:[%s3259_s0 + $0x170] ss:$12 sps:$4 sm:$0xff]   ;;  %v2427_v59 = vld [vmem:[%s3259_s0 + $0x10c] ss:$12 sps:$4 sm:$0xff]   ;;  %v2446_v60 = vld [vmem:[%s3259_s0 + $0x188] ss:$12 sps:$4 sm:$0xff]  }
  0x2b   : > { %921 = vmatprep.subr.bf16.mxu1 %v2539_v2  ;;  %2177 = vmatprep.mubr.msk.bf16.mxu0 %vm2541_vm0, %v2540_v4  ;;  %v2425_v58 = vld [vmem:[%s3259_s0 + $0xf0] ss:$12 sps:$4 sm:$0xff]   ;;  %v2429_v61 = vld [vmem:[%s3259_s0 + $0x108] ss:$12 sps:$4 sm:$0xff]   ;;  %v2450_v63 = vld [vmem:[%s3259_s0 + $0x1a0] ss:$12 sps:$4 sm:$0xff]  }
  0x2c   : > { %v2431_v62 = vld [vmem:[%s3259_s0 + $0x124] ss:$12 sps:$4 sm:$0xff]   ;;  %v2433_v0 = vld [vmem:[%s3259_s0 + $0x120] ss:$12 sps:$4 sm:$0xff]   ;;  %v2435_v1 = vld [vmem:[%s3259_s0 + $0x13c] ss:$12 sps:$4 sm:$0xff]  }
  0x2d   : > { %v2437_v3 = vld [vmem:[%s3259_s0 + $0x138] ss:$12 sps:$4 sm:$0xff]   ;;  %v2439_v5 = vld [vmem:[%s3259_s0 + $0x154] ss:$12 sps:$4 sm:$0xff]   ;;  %v2458_v6 = vld [vmem:[%s3259_s0 + $0x1d0] ss:$12 sps:$4 sm:$0xff]  }
  0x2e   : > { %922 = vmatpush1.bf16.msra.mxu1 %v2369_v10  ;;  %v2441_v7 = vld [vmem:[%s3259_s0 + $0x150] ss:$12 sps:$4 sm:$0xff]   ;;  %v2443_v8 = vld [vmem:[%s3259_s0 + $0x16c] ss:$12 sps:$4 sm:$0xff]   ;;  %v2462_v9 = vld [vmem:[%s3259_s0 + $0x1e8] ss:$12 sps:$4 sm:$0xff]  }
  0x2f   : > { %923 = vmatprep.subr.bf16.mxu1 %v2539_v2  ;;  %v2445_v10 = vld [vmem:[%s3259_s0 + $0x168] ss:$12 sps:$4 sm:$0xff]   ;;  %v2447_v11 = vld [vmem:[%s3259_s0 + $0x184] ss:$12 sps:$4 sm:$0xff]   ;;  %v2466_v12 = vld [vmem:[%s3259_s0 + $0x200] ss:$12 sps:$4 sm:$0xff]  }
  0x30   : > { %v2470_v15 = vld [vmem:[%s3259_s0 + $0x218] ss:$12 sps:$4 sm:$0xff]  }
  0x32   : > { %924 = vmatpush1.bf16.msra.mxu1 %v2370_v13  ;;  %2178 = vmatmul.mubr.msk.bf16.gmra.mrb[8].mxu0 %vm835_vm1, %v2390_v18  ;;  %v2449_v13 = vld [vmem:[%s3259_s0 + $0x180] ss:$12 sps:$4 sm:$0xff]   ;;  %v2474_v18 = vld [vmem:[%s3259_s0 + $0x230] ss:$12 sps:$4 sm:$0xff]  }
  0x33   : > { %925 = vmatprep.subr.bf16.mxu1 %v2539_v2  ;;  %2181 = vmatprep.mubr.msk.bf16.mxu0 %vm2541_vm0, %v2540_v4 }
  0x36   : > { %926 = vmatpush1.bf16.msra.mxu1 %v2371_v14  ;;  %v2451_v14 = vld [vmem:[%s3259_s0 + $0x19c] ss:$12 sps:$4 sm:$0xff]  }
  0x37   : > { %927 = vmatprep.subr.bf16.mxu1 %v2539_v2 }
  0x3a   : > { %928 = vmatpush1.bf16.msra.mxu1 %v2372_v16  ;;  %2182 = vmatmul.mubr.msk.bf16.gmra.mrb[12].mxu0 %vm835_vm1, %v2394_v21  ;;  %v2453_v16 = vld [vmem:[%s3259_s0 + $0x198] ss:$12 sps:$4 sm:$0xff]   ;;  %v2478_v21 = vld [vmem:[%s3259_s0 + $0x248] ss:$12 sps:$4 sm:$0xff]  }
  0x3b   : > { %929 = vmatprep.subr.bf16.mxu1 %v2539_v2  ;;  %2185 = vmatprep.mubr.msk.bf16.mxu0 %vm2541_vm0, %v2540_v4 }
  0x3e   : > { %930 = vmatpush1.bf16.msra.mxu1 %v2373_v17  ;;  %v2455_v17 = vld [vmem:[%s3259_s0 + $0x1b4] ss:$12 sps:$4 sm:$0xff]  }
  0x3f   : > { %931 = vmatprep.subr.bf16.mxu1 %v2539_v2 }
  0x42   : > { %932 = vmatpush1.bf16.msra.mxu1 %v2374_v19  ;;  %2186 = vmatmul.mubr.msk.bf16.gmra.mrb[16].mxu0 %vm835_vm1, %v2398_v24  ;;  %v2457_v19 = vld [vmem:[%s3259_s0 + $0x1b0] ss:$12 sps:$4 sm:$0xff]  }
  0x43   : > { %933 = vmatprep.subr.bf16.mxu1 %v2539_v2  ;;  %2189 = vmatprep.mubr.msk.bf16.mxu0 %vm2541_vm0, %v2540_v4  ;;  %v2467_v24 = vld [vmem:[%s3259_s0 + $0x1fc] ss:$12 sps:$4 sm:$0xff]  }
  0x46   : > { %934 = vmatpush1.bf16.msra.mxu1 %v2375_v20  ;;  %v2459_v20 = vld [vmem:[%s3259_s0 + $0x1cc] ss:$12 sps:$4 sm:$0xff]  }
  0x47   : > { %935 = vmatprep.subr.bf16.mxu1 %v2539_v2 }
  0x4a   : > { %936 = vmatpush1.bf16.msra.mxu1 %v2376_v22  ;;  %2190 = vmatmul.mubr.msk.bf16.gmra.mrb[20].mxu0 %vm835_vm1, %v2402_v27  ;;  %v2461_v22 = vld [vmem:[%s3259_s0 + $0x1c8] ss:$12 sps:$4 sm:$0xff]  }
  0x4b   : > { %937 = vmatprep.subr.bf16.mxu1 %v2539_v2  ;;  %2193 = vmatprep.mubr.msk.bf16.mxu0 %vm2541_vm0, %v2540_v4 }
  0x4e   : > { %938 = vmatpush1.bf16.msra.mxu1 %v2377_v23  ;;  %v2463_v23 = vld [vmem:[%s3259_s0 + $0x1e4] ss:$12 sps:$4 sm:$0xff]  }
  0x4f   : > { %939 = vmatprep.subr.bf16.mxu1 %v2539_v2 }
  0x52   : > { %940 = vmatpush1.bf16.msra.mxu1 %v2379_v25  ;;  %2194 = vmatmul.mubr.msk.bf16.gmra.mrb[24].mxu0 %vm835_vm1, %v2406_v30  ;;  %v2469_v25 = vld [vmem:[%s3259_s0 + $0x1f8] ss:$12 sps:$4 sm:$0xff]   ;;  %v2473_v30 = vld [vmem:[%s3259_s0 + $0x210] ss:$12 sps:$4 sm:$0xff]  }
  0x53   : > { %941 = vmatprep.subr.bf16.mxu1 %v2539_v2  ;;  %2197 = vmatprep.mubr.msk.bf16.mxu0 %vm2541_vm0, %v2540_v4  ;;  %v2454_v2 = vld [vmem:[%s3259_s0 + $0x1b8] ss:$12 sps:$4 sm:$0xff]  }
  0x56   : > { %942 = vmatpush1.bf16.msra.mxu1 %v2381_v26  ;;  %v2471_v26 = vld [vmem:[%s3259_s0 + $0x214] ss:$12 sps:$4 sm:$0xff]  }
  0x59   : > { %944 = vmatmul.mubr.bf16.vlgmr.msra.gmra.mrb[0].mxu1 %v2383_v28 }
  0x5a   : > { %951 = vmatprep.mubr.bf16.mxu1 %v2387_v29  ;;  %2198 = vmatmul.mubr.msk.bf16.gmra.mrb[28].mxu0 %vm835_vm1, %v2410_v33 }
  0x5b   : > { %2201 = vmatprep.mubr.msk.bf16.mxu0 %vm2541_vm0, %v2540_v4 }
  0x61   : > { %952 = vmatmul.mubr.bf16.gmra.mrb[4].mxu1 %v2389_v31 }
  0x62   : > { %959 = vmatprep.mubr.bf16.mxu1 %v2391_v32  ;;  %2202 = vmatmul.mubr.msk.bf16.gmra.mrb[32].mxu0 %vm835_vm1, %v2414_v36  ;;  %v2475_v32 = vld [vmem:[%s3259_s0 + $0x22c] ss:$12 sps:$4 sm:$0xff]   ;;  %v2477_v36 = vld [vmem:[%s3259_s0 + $0x228] ss:$12 sps:$4 sm:$0xff]  }
  0x63   : > { %2205 = vmatprep.mubr.msk.bf16.mxu0 %vm2541_vm0, %v2540_v4 }
  0x69   : > { %960 = vmatmul.mubr.bf16.gmra.mrb[8].mxu1 %v2393_v34 }
  0x6a   : > { %967 = vmatprep.mubr.bf16.mxu1 %v2395_v35  ;;  %2206 = vmatmul.mubr.msk.bf16.gmra.mrb[36].mxu0 %vm835_vm1, %v2418_v39 }
  0x6b   : > { %2209 = vmatprep.mubr.msk.bf16.mxu0 %vm2541_vm0, %v2540_v4 }
  0x71   : > { %968 = vmatmul.mubr.bf16.gmra.mrb[12].mxu1 %v2397_v37 }
  0x72   : > { %975 = vmatprep.mubr.bf16.mxu1 %v2399_v38  ;;  %2210 = vmatmul.mubr.msk.bf16.gmra.mrb[40].mxu0 %vm835_vm1, %v2422_v42  ;;  %v2479_v38 = vld [vmem:[%s3259_s0 + $0x244] ss:$12 sps:$4 sm:$0xff]   ;;  %v2481_v42 = vld [vmem:[%s3259_s0 + $0x240] ss:$12 sps:$4 sm:$0xff]  }
  0x73   : > { %2213 = vmatprep.mubr.msk.bf16.mxu0 %vm2541_vm0, %v2540_v4 }
  0x79   : > { %976 = vmatmul.mubr.bf16.gmra.mrb[16].mxu1 %v2401_v40 }
  0x7a   : > { %983 = vmatprep.mubr.bf16.mxu1 %v2403_v41  ;;  %2214 = vmatmul.mubr.msk.bf16.gmra.mrb[44].mxu0 %vm835_vm1, %v2426_v45 }
  0x7b   : > { %2217 = vmatprep.mubr.msk.bf16.mxu0 %vm2541_vm0, %v2540_v4 }
  0x81   : > { %984 = vmatmul.mubr.bf16.gmra.mrb[20].mxu1 %v2405_v43 }
  0x82   : > { %991 = vmatprep.mubr.bf16.mxu1 %v2407_v44  ;;  %2218 = vmatmul.mubr.msk.bf16.gmra.mrb[48].mxu0 %vm835_vm1, %v2430_v48 }
  0x83   : > { %2221 = vmatprep.mubr.msk.bf16.mxu0 %vm2541_vm0, %v2540_v4 }
  0x89   : > { %992 = vmatmul.mubr.bf16.gmra.mrb[24].mxu1 %v2409_v46 }
  0x8a   : > { %999 = vmatprep.mubr.bf16.mxu1 %v2411_v47  ;;  %2222 = vmatmul.mubr.msk.bf16.gmra.mrb[52].mxu0 %vm835_vm1, %v2434_v51 }
  0x8b   : > { %2225 = vmatprep.mubr.msk.bf16.mxu0 %vm2541_vm0, %v2540_v4 }
  0x91   : > { %1000 = vmatmul.mubr.bf16.gmra.mrb[28].mxu1 %v2413_v49 }
  0x92   : > { %1007 = vmatprep.mubr.bf16.mxu1 %v2415_v50  ;;  %2226 = vmatmul.mubr.msk.bf16.gmra.mrb[56].mxu0 %vm835_vm1, %v2438_v54 }
  0x93   : > { %2229 = vmatprep.mubr.msk.bf16.mxu0 %vm2541_vm0, %v2540_v4 }
  0x99   : > { %1008 = vmatmul.mubr.bf16.gmra.mrb[32].mxu1 %v2417_v52 }
  0x9a   : > { %1015 = vmatprep.mubr.bf16.mxu1 %v2419_v53  ;;  %2230 = vmatmul.mubr.msk.bf16.gmra.mrb[60].mxu0 %vm835_vm1, %v2442_v57 }
  0x9b   : > { %2233 = vmatprep.mubr.msk.bf16.mxu0 %vm2541_vm0, %v2540_v4 }
  0xa1   : > { %1016 = vmatmul.mubr.bf16.gmra.mrb[36].mxu1 %v2421_v55 }
  0xa2   : > { %1023 = vmatprep.mubr.bf16.mxu1 %v2423_v56  ;;  %2234 = vmatmul.mubr.msk.bf16.gmra.mrb[64].mxu0 %vm835_vm1, %v2446_v60 }
  0xa3   : > { %2237 = vmatprep.mubr.msk.bf16.mxu0 %vm2541_vm0, %v2540_v4 }
  0xa9   : > { %1024 = vmatmul.mubr.bf16.gmra.mrb[40].mxu1 %v2425_v58 }
  0xaa   : > { %1031 = vmatprep.mubr.bf16.mxu1 %v2427_v59  ;;  %2238 = vmatmul.mubr.msk.bf16.gmra.mrb[68].mxu0 %vm835_vm1, %v2450_v63 }
  0xab   : > { %2241 = vmatprep.mubr.msk.bf16.mxu0 %vm2541_vm0, %v2540_v4 }
  0xb1   : > { %1032 = vmatmul.mubr.bf16.gmra.mrb[44].mxu1 %v2429_v61 }
  0xb2   : > { %1039 = vmatprep.mubr.bf16.mxu1 %v2431_v62  ;;  %2242 = vmatmul.mubr.msk.bf16.gmra.mrb[72].mxu0 %vm835_vm1, %v2454_v2 }
  0xb3   : > { %2245 = vmatprep.mubr.msk.bf16.mxu0 %vm2541_vm0, %v2540_v4 }
  0xb9   : > { %1040 = vmatmul.mubr.bf16.gmra.mrb[48].mxu1 %v2433_v0 }
  0xba   : > { %1047 = vmatprep.mubr.bf16.mxu1 %v2435_v1  ;;  %2246 = vmatmul.mubr.msk.bf16.gmra.mrb[76].mxu0 %vm835_vm1, %v2458_v6 }
  0xbb   : > { %2249 = vmatprep.mubr.msk.bf16.mxu0 %vm2541_vm0, %v2540_v4 }
  0xc1   : > { %1048 = vmatmul.mubr.bf16.gmra.mrb[52].mxu1 %v2437_v3 }
  0xc2   : > { %1055 = vmatprep.mubr.bf16.mxu1 %v2439_v5  ;;  %2250 = vmatmul.mubr.msk.bf16.gmra.mrb[80].mxu0 %vm835_vm1, %v2462_v9 }
  0xc3   : > { %2253 = vmatprep.mubr.msk.bf16.mxu0 %vm2541_vm0, %v2540_v4 }
  0xc9   : > { %1056 = vmatmul.mubr.bf16.gmra.mrb[56].mxu1 %v2441_v7 }
  0xca   : > { %1063 = vmatprep.mubr.bf16.mxu1 %v2443_v8  ;;  %2254 = vmatmul.mubr.msk.bf16.gmra.mrb[84].mxu0 %vm835_vm1, %v2466_v12 }
  0xcb   : > { %2257 = vmatprep.mubr.msk.bf16.mxu0 %vm2541_vm0, %v2540_v4 }
  0xd1   : > { %1064 = vmatmul.mubr.bf16.gmra.mrb[60].mxu1 %v2445_v10 }
  0xd2   : > { %1071 = vmatprep.mubr.bf16.mxu1 %v2447_v11  ;;  %2258 = vmatmul.mubr.msk.bf16.gmra.mrb[88].mxu0 %vm835_vm1, %v2470_v15 }
  0xd3   : > { %2261 = vmatprep.mubr.msk.bf16.mxu0 %vm2541_vm0, %v2540_v4 }
  0xd9   : > { %1072 = vmatmul.mubr.bf16.gmra.mrb[64].mxu1 %v2449_v13 }
  0xda   : > { %1079 = vmatprep.mubr.bf16.mxu1 %v2451_v14  ;;  %2262 = vmatmul.mubr.msk.bf16.gmra.mrb[92].mxu0 %vm835_vm1, %v2474_v18 }
  0xdb   : > { %2265 = vmatprep.mubr.msk.bf16.mxu0 %vm2541_vm0, %v2540_v4  ;;  %v2465_v4 = vld [vmem:[%s3259_s0 + $0x1e0] ss:$12 sps:$4 sm:$0xff]  }
  0xe1   : > { %1080 = vmatmul.mubr.bf16.gmra.mrb[68].mxu1 %v2453_v16 }
  0xe2   : > { %1087 = vmatprep.mubr.bf16.mxu1 %v2455_v17  ;;  %2266 = vmatmul.mubr.msk.bf16.gmra.mrb[96].mxu0 %vm835_vm1, %v2478_v21 }
  0xe9   : > { %1088 = vmatmul.mubr.bf16.gmra.mrb[72].mxu1 %v2457_v19 }
  0xea   : > { %1095 = vmatprep.mubr.bf16.mxu1 %v2459_v20 }
  0xf1   : > { %1096 = vmatmul.mubr.bf16.gmra.mrb[76].mxu1 %v2461_v22 }
  0xf2   : > { %1103 = vmatprep.mubr.bf16.mxu1 %v2463_v23 }
  0xf5   : > { %v1178_v27 = vpop.f32.mrb[0].mxu0 }
  0xf6   : > { %v2171_v28 = vpop.f32.mrb[1].mxu0 }
  0xf7   : > { %v1181_v29 = vpop.f32.mrb[2].mxu0 }
  0xf8   : > { %v2172_v31 = vpop.f32.mrb[3].mxu0 }
  0xf9   : > { %1104 = vmatmul.mubr.bf16.gmra.mrb[80].mxu1 %v2465_v4 }
  0xfa   : > { %1111 = vmatprep.mubr.bf16.mxu1 %v2467_v24 }
  0xfd   : > { %v1186_v33 = vpop.f32.mrb[4].mxu0 }
  0xfe   : > { %v2175_v34 = vpop.f32.mrb[5].mxu0 }
  0xff   : > { %v1189_v35 = vpop.f32.mrb[6].mxu0 }
 0x100   : > { %v2176_v37 = vpop.f32.mrb[7].mxu0 }
 0x101   : > { %1112 = vmatmul.mubr.bf16.gmra.mrb[84].mxu1 %v2469_v25 }
 0x102   : > { %1119 = vmatprep.mubr.bf16.mxu1 %v2471_v26 }
 0x105   : > { %v1194_v39 = vpop.f32.mrb[8].mxu0 }
 0x106   : > { %v2179_v40 = vpop.f32.mrb[9].mxu0 }
 0x107   : > { %v1197_v41 = vpop.f32.mrb[10].mxu0 }
 0x108   : > { %v2180_v43 = vpop.f32.mrb[11].mxu0 }
 0x109   : > { %1120 = vmatmul.mubr.bf16.gmra.mrb[88].mxu1 %v2473_v30 }
 0x10a   : > { %1127 = vmatprep.mubr.bf16.mxu1 %v2475_v32 }
 0x10d   : > { %v2966_v44 = vpop.f32.mrb[12].mxu0 }
 0x10e   : > { %v2183_v45 = vpop.f32.mrb[13].mxu0 }
 0x10f   : > { %v2968_v46 = vpop.f32.mrb[14].mxu0 }
 0x110   : > { %v2184_v47 = vpop.f32.mrb[15].mxu0 }
 0x111   : > { %1128 = vmatmul.mubr.bf16.gmra.mrb[92].mxu1 %v2477_v36 }
 0x112   : > { %1135 = vmatprep.mubr.bf16.mxu1 %v2479_v38 }
 0x115   : > { %v2970_v48 = vpop.f32.mrb[16].mxu0 }
 0x116   : > { %v2187_v49 = vpop.f32.mrb[17].mxu0 }
 0x117   : > { %v2972_v50 = vpop.f32.mrb[18].mxu0 }
 0x118   : > { %v2188_v51 = vpop.f32.mrb[19].mxu0 }
 0x119   : > { %1136 = vmatmul.mubr.bf16.gmra.mrb[96].mxu1 %v2481_v42 }
 0x11d   : > { %v2974_v52 = vpop.f32.mrb[20].mxu0 }
 0x11e   : > { %v2191_v53 = vpop.f32.mrb[21].mxu0 }
 0x11f   : > { %v2976_v55 = vpop.f32.mrb[22].mxu0 }
 0x120   : > { %v2192_v58 = vpop.f32.mrb[23].mxu0 }
 0x125   : > { %v2978_v2 = vpop.f32.mrb[24].mxu0 }
 0x126   : > { %v2195_v5 = vpop.f32.mrb[25].mxu0 }
 0x127   : > { %v2980_v7 = vpop.f32.mrb[26].mxu0 }
 0x128   : > { %v2196_v10 = vpop.f32.mrb[27].mxu0 }
 0x12c   : > { %v945_v54 = vpop.f32.mrb[0].mxu1 }
 0x12d   : > { %v1179_v56 = vadd.f32 %v1178_v27, %v945_v54  ;;  %v947_v57 = vpop.f32.mrb[1].mxu1  ;;  %v2982_v20 = vpop.f32.mrb[28].mxu0 }
 0x12e   : > { %v948_v59 = vpop.f32.mrb[2].mxu1  ;;  %v2199_v22 = vpop.f32.mrb[29].mxu0 }
 0x12f   : > { %v1182_v60 = vadd.f32 %v1181_v29, %v948_v59  ;;  %v950_v61 = vpop.f32.mrb[3].mxu1  ;;  %v1436_v62 = vmul.f32 %v1179_v56, %v1179_v56  ;;  %v2984_v4 = vpop.f32.mrb[30].mxu0 }
 0x130   : > { %v2200_v26 = vpop.f32.mrb[31].mxu0 }
 0x131   : > { %v1378_v63 = vadd.f32 %v1182_v60, %v1179_v56  ;;  %v1437_v0 = vmul.f32 %v1182_v60, %v1182_v60  ;;  %v1544_v1 = vpack.c.bf16 %v1182_v60, %v1179_v56 }
 0x133   : > { %v1486_v3 = vadd.f32 %v1437_v0, %v1436_v62  ;;  %1573 = vst [vmem:[#allocation2] sm:$0xff] %v1544_v1 }
 0x134   : > { %v953_v6 = vpop.f32.mrb[4].mxu1 }
 0x135   : > { %v1187_v8 = vadd.f32 %v1186_v33, %v953_v6  ;;  %v955_v9 = vpop.f32.mrb[5].mxu1  ;;  %v2986_v36 = vpop.f32.mrb[32].mxu0 }
 0x136   : > { %v956_v11 = vpop.f32.mrb[6].mxu1  ;;  %v2203_v38 = vpop.f32.mrb[33].mxu0 }
 0x137   : > { %v1379_v12 = vadd.f32 %v1378_v63, %v1187_v8  ;;  %v1438_v13 = vmul.f32 %v1187_v8, %v1187_v8  ;;  %v1190_v14 = vadd.f32 %v1189_v35, %v956_v11  ;;  %v958_v15 = vpop.f32.mrb[7].mxu1  ;;  %v2988_v42 = vpop.f32.mrb[34].mxu0 }
 0x138   : > { %v2204_v45 = vpop.f32.mrb[35].mxu0 }
 0x139   : > { %v1487_v16 = vadd.f32 %v1486_v3, %v1438_v13  ;;  %v1380_v17 = vadd.f32 %v1379_v12, %v1190_v14  ;;  %v1439_v18 = vmul.f32 %v1190_v14, %v1190_v14  ;;  %v1545_v19 = vpack.c.bf16 %v1190_v14, %v1187_v8 }
 0x13b   : > { %v1488_v21 = vadd.f32 %v1487_v16, %v1439_v18  ;;  %1574 = vst [vmem:[#allocation2 + $0x8] sm:$0xff] %v1545_v19 }
 0x13c   : > { %v961_v23 = vpop.f32.mrb[8].mxu1 }
 0x13d   : > { %v1195_v24 = vadd.f32 %v1194_v39, %v961_v23  ;;  %v963_v25 = vpop.f32.mrb[9].mxu1  ;;  %v2992_v59 = vpop.f32.mrb[36].mxu0 }
 0x13e   : > { %v964_v27 = vpop.f32.mrb[10].mxu1  ;;  %v2207_v61 = vpop.f32.mrb[37].mxu0 }
 0x13f   : > { %v1381_v28 = vadd.f32 %v1380_v17, %v1195_v24  ;;  %v1440_v29 = vmul.f32 %v1195_v24, %v1195_v24  ;;  %v1198_v30 = vadd.f32 %v1197_v41, %v964_v27  ;;  %v966_v31 = vpop.f32.mrb[11].mxu1  ;;  %v2994_v63 = vpop.f32.mrb[38].mxu0 }
 0x140   : > { %v2208_v1 = vpop.f32.mrb[39].mxu0 }
 0x141   : > { %v1489_v32 = vadd.f32 %v1488_v21, %v1440_v29  ;;  %v1382_v33 = vadd.f32 %v1381_v28, %v1198_v30  ;;  %v1441_v34 = vmul.f32 %v1198_v30, %v1198_v30  ;;  %v1546_v35 = vpack.c.bf16 %v1198_v30, %v1195_v24 }
 0x143   : > { %v1490_v37 = vadd.f32 %v1489_v32, %v1441_v34  ;;  %1575 = vst [vmem:[#allocation2 + $0x10] sm:$0xff] %v1546_v35 }
 0x144   : > { %v969_v40 = vpop.f32.mrb[12].mxu1 }
 0x145   : > { %v1203_v39 = vadd.f32 %v2966_v44, %v969_v40  ;;  %v971_v43 = vpop.f32.mrb[13].mxu1  ;;  %v2998_v13 = vpop.f32.mrb[40].mxu0 }
 0x146   : > { %v972_v47 = vpop.f32.mrb[14].mxu1  ;;  %v2211_v15 = vpop.f32.mrb[41].mxu0 }
 0x147   : > { %v1383_v49 = vadd.f32 %v1382_v33, %v1203_v39  ;;  %v1442_v41 = vmul.f32 %v1203_v39, %v1203_v39  ;;  %v1206_v51 = vadd.f32 %v2968_v46, %v972_v47  ;;  %v974_v53 = vpop.f32.mrb[15].mxu1  ;;  %v3000_v17 = vpop.f32.mrb[42].mxu0 }
 0x148   : > { %v2212_v19 = vpop.f32.mrb[43].mxu0 }
 0x149   : > { %v1491_v54 = vadd.f32 %v1490_v37, %v1442_v41  ;;  %v1384_v56 = vadd.f32 %v1383_v49, %v1206_v51  ;;  %v1443_v57 = vmul.f32 %v1206_v51, %v1206_v51  ;;  %v1547_v58 = vpack.c.bf16 %v1206_v51, %v1203_v39 }
 0x14b   : > { %v1492_v60 = vadd.f32 %v1491_v54, %v1443_v57  ;;  %1576 = vst [vmem:[#allocation2 + $0x18] sm:$0xff] %v1547_v58 }
 0x14c   : > { %v977_v62 = vpop.f32.mrb[16].mxu1 }
 0x14d   : > { %v1211_v44 = vadd.f32 %v2970_v48, %v977_v62  ;;  %v979_v0 = vpop.f32.mrb[17].mxu1  ;;  %v3004_v29 = vpop.f32.mrb[44].mxu0 }
 0x14e   : > { %v980_v3 = vpop.f32.mrb[18].mxu1  ;;  %v2215_v31 = vpop.f32.mrb[45].mxu0 }
 0x14f   : > { %v1385_v5 = vadd.f32 %v1384_v56, %v1211_v44  ;;  %v1444_v46 = vmul.f32 %v1211_v44, %v1211_v44  ;;  %v1214_v6 = vadd.f32 %v2972_v50, %v980_v3  ;;  %v982_v8 = vpop.f32.mrb[19].mxu1  ;;  %v3006_v33 = vpop.f32.mrb[46].mxu0 }
 0x150   : > { %v2216_v35 = vpop.f32.mrb[47].mxu0 }
 0x151   : > { %v1493_v9 = vadd.f32 %v1492_v60, %v1444_v46  ;;  %v1386_v10 = vadd.f32 %v1385_v5, %v1214_v6  ;;  %v1445_v11 = vmul.f32 %v1214_v6, %v1214_v6  ;;  %v1548_v12 = vpack.c.bf16 %v1214_v6, %v1211_v44 }
 0x153   : > { %v1494_v14 = vadd.f32 %v1493_v9, %v1445_v11  ;;  %1577 = vst [vmem:[#allocation2 + $0x20] sm:$0xff] %v1548_v12 }
 0x154   : > { %v985_v16 = vpop.f32.mrb[20].mxu1 }
 0x155   : > { %v1219_v48 = vadd.f32 %v2974_v52, %v985_v16  ;;  %v987_v18 = vpop.f32.mrb[21].mxu1  ;;  %v3010_v41 = vpop.f32.mrb[48].mxu0 }
 0x156   : > { %v988_v21 = vpop.f32.mrb[22].mxu1  ;;  %v2219_v53 = vpop.f32.mrb[49].mxu0 }
 0x157   : > { %v1387_v22 = vadd.f32 %v1386_v10, %v1219_v48  ;;  %v1446_v50 = vmul.f32 %v1219_v48, %v1219_v48  ;;  %v1222_v23 = vadd.f32 %v2976_v55, %v988_v21  ;;  %v990_v24 = vpop.f32.mrb[23].mxu1  ;;  %v3012_v56 = vpop.f32.mrb[50].mxu0 }
 0x158   : > { %v2220_v58 = vpop.f32.mrb[51].mxu0 }
 0x159   : > { %v1495_v25 = vadd.f32 %v1494_v14, %v1446_v50  ;;  %v1388_v26 = vadd.f32 %v1387_v22, %v1222_v23  ;;  %v1447_v27 = vmul.f32 %v1222_v23, %v1222_v23  ;;  %v1549_v28 = vpack.c.bf16 %v1222_v23, %v1219_v48 }
 0x15b   : > { %v1496_v30 = vadd.f32 %v1495_v25, %v1447_v27  ;;  %1578 = vst [vmem:[#allocation2 + $0x28] sm:$0xff] %v1549_v28 }
 0x15c   : > { %v993_v32 = vpop.f32.mrb[24].mxu1 }
 0x15d   : > { %v1227_v52 = vadd.f32 %v2978_v2, %v993_v32  ;;  %v995_v34 = vpop.f32.mrb[25].mxu1  ;;  %v3016_v46 = vpop.f32.mrb[52].mxu0 }
 0x15e   : > { %v996_v37 = vpop.f32.mrb[26].mxu1  ;;  %v2223_v8 = vpop.f32.mrb[53].mxu0 }
 0x15f   : > { %v1389_v38 = vadd.f32 %v1388_v26, %v1227_v52  ;;  %v1448_v55 = vmul.f32 %v1227_v52, %v1227_v52  ;;  %v1230_v40 = vadd.f32 %v2980_v7, %v996_v37  ;;  %v998_v39 = vpop.f32.mrb[27].mxu1  ;;  %v3018_v10 = vpop.f32.mrb[54].mxu0 }
 0x160   : > { %v2224_v12 = vpop.f32.mrb[55].mxu0 }
 0x161   : > { %v1497_v43 = vadd.f32 %v1496_v30, %v1448_v55  ;;  %v1390_v45 = vadd.f32 %v1389_v38, %v1230_v40  ;;  %v1449_v47 = vmul.f32 %v1230_v40, %v1230_v40  ;;  %v1550_v49 = vpack.c.bf16 %v1230_v40, %v1227_v52 }
 0x163   : > { %v1498_v51 = vadd.f32 %v1497_v43, %v1449_v47  ;;  %1579 = vst [vmem:[#allocation2 + $0x30] sm:$0xff] %v1550_v49 }
 0x164   : > { %v1001_v54 = vpop.f32.mrb[28].mxu1 }
 0x165   : > { %v1235_v2 = vadd.f32 %v2982_v20, %v1001_v54  ;;  %v1003_v57 = vpop.f32.mrb[29].mxu1  ;;  %v3022_v50 = vpop.f32.mrb[56].mxu0 }
 0x166   : > { %v1004_v60 = vpop.f32.mrb[30].mxu1  ;;  %v2227_v24 = vpop.f32.mrb[57].mxu0 }
 0x167   : > { %v1391_v61 = vadd.f32 %v1390_v45, %v1235_v2  ;;  %v1450_v7 = vmul.f32 %v1235_v2, %v1235_v2  ;;  %v1238_v62 = vadd.f32 %v2984_v4, %v1004_v60  ;;  %v1006_v44 = vpop.f32.mrb[31].mxu1  ;;  %v3024_v26 = vpop.f32.mrb[58].mxu0 }
 0x168   : > { %v2228_v28 = vpop.f32.mrb[59].mxu0 }
 0x169   : > { %v1499_v0 = vadd.f32 %v1498_v51, %v1450_v7  ;;  %v1392_v1 = vadd.f32 %v1391_v61, %v1238_v62  ;;  %v1451_v3 = vmul.f32 %v1238_v62, %v1238_v62  ;;  %v1551_v5 = vpack.c.bf16 %v1238_v62, %v1235_v2 }
 0x16b   : > { %v1500_v6 = vadd.f32 %v1499_v0, %v1451_v3  ;;  %1580 = vst [vmem:[#allocation2 + $0x38] sm:$0xff] %v1551_v5 }
 0x16c   : > { %v1009_v9 = vpop.f32.mrb[32].mxu1 }
 0x16d   : > { %v1243_v20 = vadd.f32 %v2986_v36, %v1009_v9  ;;  %v1011_v11 = vpop.f32.mrb[33].mxu1  ;;  %v3028_v55 = vpop.f32.mrb[60].mxu0 }
 0x16e   : > { %v1012_v14 = vpop.f32.mrb[34].mxu1  ;;  %v2231_v39 = vpop.f32.mrb[61].mxu0 }
 0x16f   : > { %v1393_v15 = vadd.f32 %v1392_v1, %v1243_v20  ;;  %v1452_v4 = vmul.f32 %v1243_v20, %v1243_v20  ;;  %v1246_v16 = vadd.f32 %v2988_v42, %v1012_v14  ;;  %v1014_v48 = vpop.f32.mrb[35].mxu1  ;;  %v3030_v45 = vpop.f32.mrb[62].mxu0 }
 0x170   : > { %v2232_v49 = vpop.f32.mrb[63].mxu0 }
 0x171   : > { %v1501_v18 = vadd.f32 %v1500_v6, %v1452_v4  ;;  %v1394_v19 = vadd.f32 %v1393_v15, %v1246_v16  ;;  %v1453_v21 = vmul.f32 %v1246_v16, %v1246_v16  ;;  %v1552_v22 = vpack.c.bf16 %v1246_v16, %v1243_v20 }
 0x173   : > { %v1502_v23 = vadd.f32 %v1501_v18, %v1453_v21  ;;  %1581 = vst [vmem:[#allocation2 + $0x40] sm:$0xff] %v1552_v22 }
 0x174   : > { %v1017_v25 = vpop.f32.mrb[36].mxu1 }
 0x175   : > { %v1251_v36 = vadd.f32 %v2992_v59, %v1017_v25  ;;  %v1019_v27 = vpop.f32.mrb[37].mxu1  ;;  %v3034_v7 = vpop.f32.mrb[64].mxu0 }
 0x176   : > { %v1020_v30 = vpop.f32.mrb[38].mxu1  ;;  %v2235_v44 = vpop.f32.mrb[65].mxu0 }
 0x177   : > { %v1395_v31 = vadd.f32 %v1394_v19, %v1251_v36  ;;  %v1454_v42 = vmul.f32 %v1251_v36, %v1251_v36  ;;  %v1254_v32 = vadd.f32 %v2994_v63, %v1020_v30  ;;  %v1022_v52 = vpop.f32.mrb[39].mxu1  ;;  %v3036_v1 = vpop.f32.mrb[66].mxu0 }
 0x178   : > { %v2236_v5 = vpop.f32.mrb[67].mxu0 }
 0x179   : > { %v1503_v34 = vadd.f32 %v1502_v23, %v1454_v42  ;;  %v1396_v35 = vadd.f32 %v1395_v31, %v1254_v32  ;;  %v1455_v37 = vmul.f32 %v1254_v32, %v1254_v32  ;;  %v1553_v38 = vpack.c.bf16 %v1254_v32, %v1251_v36 }
 0x17b   : > { %v1504_v40 = vadd.f32 %v1503_v34, %v1455_v37  ;;  %1582 = vst [vmem:[#allocation2 + $0x48] sm:$0xff] %v1553_v38 }
 0x17c   : > { %v1025_v43 = vpop.f32.mrb[40].mxu1 }
 0x17d   : > { %v1259_v59 = vadd.f32 %v2998_v13, %v1025_v43  ;;  %v1027_v47 = vpop.f32.mrb[41].mxu1  ;;  %v3040_v4 = vpop.f32.mrb[68].mxu0 }
 0x17e   : > { %v1028_v51 = vpop.f32.mrb[42].mxu1  ;;  %v2239_v48 = vpop.f32.mrb[69].mxu0 }
 0x17f   : > { %v1397_v53 = vadd.f32 %v1396_v35, %v1259_v59  ;;  %v1456_v63 = vmul.f32 %v1259_v59, %v1259_v59  ;;  %v1262_v54 = vadd.f32 %v3000_v17, %v1028_v51  ;;  %v1030_v2 = vpop.f32.mrb[43].mxu1  ;;  %v3042_v19 = vpop.f32.mrb[70].mxu0 }
 0x180   : > { %v2240_v22 = vpop.f32.mrb[71].mxu0 }
 0x181   : > { %v1505_v57 = vadd.f32 %v1504_v40, %v1456_v63  ;;  %v1398_v58 = vadd.f32 %v1397_v53, %v1262_v54  ;;  %v1457_v60 = vmul.f32 %v1262_v54, %v1262_v54  ;;  %v1554_v61 = vpack.c.bf16 %v1262_v54, %v1259_v59 }
 0x183   : > { %v1506_v62 = vadd.f32 %v1505_v57, %v1457_v60  ;;  %1583 = vst [vmem:[#allocation2 + $0x50] sm:$0xff] %v1554_v61 }
 0x184   : > { %v1033_v0 = vpop.f32.mrb[44].mxu1 }
 0x185   : > { %v1267_v13 = vadd.f32 %v3004_v29, %v1033_v0  ;;  %v1035_v3 = vpop.f32.mrb[45].mxu1  ;;  %v3046_v42 = vpop.f32.mrb[72].mxu0 }
 0x186   : > { %v1036_v6 = vpop.f32.mrb[46].mxu1  ;;  %v2243_v52 = vpop.f32.mrb[73].mxu0 }
 0x187   : > { %v1399_v8 = vadd.f32 %v1398_v58, %v1267_v13  ;;  %v1458_v17 = vmul.f32 %v1267_v13, %v1267_v13  ;;  %v1270_v9 = vadd.f32 %v3006_v33, %v1036_v6  ;;  %v1038_v20 = vpop.f32.mrb[47].mxu1  ;;  %v3048_v35 = vpop.f32.mrb[74].mxu0 }
 0x188   : > { %v2244_v38 = vpop.f32.mrb[75].mxu0 }
 0x189   : > { %v1507_v11 = vadd.f32 %v1506_v62, %v1458_v17  ;;  %v1400_v12 = vadd.f32 %v1399_v8, %v1270_v9  ;;  %v1459_v14 = vmul.f32 %v1270_v9, %v1270_v9  ;;  %v1555_v15 = vpack.c.bf16 %v1270_v9, %v1267_v13 }
 0x18b   : > { %v1508_v16 = vadd.f32 %v1507_v11, %v1459_v14  ;;  %1584 = vst [vmem:[#allocation2 + $0x58] sm:$0xff] %v1555_v15 }
 0x18c   : > { %v1041_v18 = vpop.f32.mrb[48].mxu1 }
 0x18d   : > { %v1275_v29 = vadd.f32 %v3010_v41, %v1041_v18  ;;  %v1043_v21 = vpop.f32.mrb[49].mxu1  ;;  %v3052_v63 = vpop.f32.mrb[76].mxu0 }
 0x18e   : > { %v1044_v23 = vpop.f32.mrb[50].mxu1  ;;  %v2247_v2 = vpop.f32.mrb[77].mxu0 }
 0x18f   : > { %v1401_v24 = vadd.f32 %v1400_v12, %v1275_v29  ;;  %v1460_v33 = vmul.f32 %v1275_v29, %v1275_v29  ;;  %v1278_v25 = vadd.f32 %v3012_v56, %v1044_v23  ;;  %v1046_v36 = vpop.f32.mrb[51].mxu1  ;;  %v3054_v58 = vpop.f32.mrb[78].mxu0 }
 0x190   : > { %v2248_v61 = vpop.f32.mrb[79].mxu0 }
 0x191   : > { %v1509_v27 = vadd.f32 %v1508_v16, %v1460_v33  ;;  %v1402_v28 = vadd.f32 %v1401_v24, %v1278_v25  ;;  %v1461_v30 = vmul.f32 %v1278_v25, %v1278_v25  ;;  %v1556_v31 = vpack.c.bf16 %v1278_v25, %v1275_v29 }
 0x193   : > { %v1510_v32 = vadd.f32 %v1509_v27, %v1461_v30  ;;  %1585 = vst [vmem:[#allocation2 + $0x60] sm:$0xff] %v1556_v31 }
 0x194   : > { %v1049_v34 = vpop.f32.mrb[52].mxu1 }
 0x195   : > { %v1283_v41 = vadd.f32 %v3016_v46, %v1049_v34  ;;  %v1051_v37 = vpop.f32.mrb[53].mxu1  ;;  %v3058_v17 = vpop.f32.mrb[80].mxu0 }
 0x196   : > { %v1052_v40 = vpop.f32.mrb[54].mxu1  ;;  %v2251_v20 = vpop.f32.mrb[81].mxu0 }
 0x197   : > { %v1403_v39 = vadd.f32 %v1402_v28, %v1283_v41  ;;  %v1462_v56 = vmul.f32 %v1283_v41, %v1283_v41  ;;  %v1286_v43 = vadd.f32 %v3018_v10, %v1052_v40  ;;  %v1054_v59 = vpop.f32.mrb[55].mxu1  ;;  %v3060_v12 = vpop.f32.mrb[82].mxu0 }
 0x198   : > { %v2252_v15 = vpop.f32.mrb[83].mxu0 }
 0x199   : > { %v1511_v47 = vadd.f32 %v1510_v32, %v1462_v56  ;;  %v1404_v49 = vadd.f32 %v1403_v39, %v1286_v43  ;;  %v1463_v51 = vmul.f32 %v1286_v43, %v1286_v43  ;;  %v1557_v53 = vpack.c.bf16 %v1286_v43, %v1283_v41 }
 0x19b   : > { %v1512_v54 = vadd.f32 %v1511_v47, %v1463_v51  ;;  %1586 = vst [vmem:[#allocation2 + $0x68] sm:$0xff] %v1557_v53 }
 0x19c   : > { %v1057_v57 = vpop.f32.mrb[56].mxu1 }
 0x19d   : > { %v1291_v46 = vadd.f32 %v3022_v50, %v1057_v57  ;;  %v1059_v60 = vpop.f32.mrb[57].mxu1  ;;  %v3064_v33 = vpop.f32.mrb[84].mxu0 }
 0x19e   : > { %v1060_v62 = vpop.f32.mrb[58].mxu1  ;;  %v2255_v36 = vpop.f32.mrb[85].mxu0 }
 0x19f   : > { %v1405_v44 = vadd.f32 %v1404_v49, %v1291_v46  ;;  %v1464_v10 = vmul.f32 %v1291_v46, %v1291_v46  ;;  %v1294_v0 = vadd.f32 %v3024_v26, %v1060_v62  ;;  %v1062_v13 = vpop.f32.mrb[59].mxu1  ;;  %v3066_v28 = vpop.f32.mrb[86].mxu0 }
 0x1a0   : > { %v2256_v31 = vpop.f32.mrb[87].mxu0 }
 0x1a1   : > { %v1513_v3 = vadd.f32 %v1512_v54, %v1464_v10  ;;  %v1406_v5 = vadd.f32 %v1405_v44, %v1294_v0  ;;  %v1465_v6 = vmul.f32 %v1294_v0, %v1294_v0  ;;  %v1558_v8 = vpack.c.bf16 %v1294_v0, %v1291_v46 }
 0x1a3   : > { %v1514_v9 = vadd.f32 %v1513_v3, %v1465_v6  ;;  %1587 = vst [vmem:[#allocation2 + $0x70] sm:$0xff] %v1558_v8 }
 0x1a4   : > { %v1065_v11 = vpop.f32.mrb[60].mxu1 }
 0x1a5   : > { %v1299_v50 = vadd.f32 %v3028_v55, %v1065_v11  ;;  %v1067_v14 = vpop.f32.mrb[61].mxu1  ;;  %v3070_v56 = vpop.f32.mrb[88].mxu0 }
 0x1a6   : > { %v1068_v16 = vpop.f32.mrb[62].mxu1  ;;  %v2259_v59 = vpop.f32.mrb[89].mxu0 }
 0x1a7   : > { %v1407_v48 = vadd.f32 %v1406_v5, %v1299_v50  ;;  %v1466_v26 = vmul.f32 %v1299_v50, %v1299_v50  ;;  %v1302_v18 = vadd.f32 %v3030_v45, %v1068_v16  ;;  %v1070_v29 = vpop.f32.mrb[63].mxu1  ;;  %v3072_v49 = vpop.f32.mrb[90].mxu0 }
 0x1a8   : > { %v2260_v53 = vpop.f32.mrb[91].mxu0 }
 0x1a9   : > { %v1515_v21 = vadd.f32 %v1514_v9, %v1466_v26  ;;  %v1408_v22 = vadd.f32 %v1407_v48, %v1302_v18  ;;  %v1467_v23 = vmul.f32 %v1302_v18, %v1302_v18  ;;  %v1559_v24 = vpack.c.bf16 %v1302_v18, %v1299_v50 }
 0x1ab   : > { %v1516_v25 = vadd.f32 %v1515_v21, %v1467_v23  ;;  %1588 = vst [vmem:[#allocation2 + $0x78] sm:$0xff] %v1559_v24 }
 0x1ac   : > { %v1073_v27 = vpop.f32.mrb[64].mxu1 }
 0x1ad   : > { %v1307_v55 = vadd.f32 %v3034_v7, %v1073_v27  ;;  %v1075_v30 = vpop.f32.mrb[65].mxu1  ;;  %v3076_v10 = vpop.f32.mrb[92].mxu0 }
 0x1ae   : > { %v1076_v32 = vpop.f32.mrb[66].mxu1  ;;  %v2263_v13 = vpop.f32.mrb[93].mxu0 }
 0x1af   : > { %v1409_v52 = vadd.f32 %v1408_v22, %v1307_v55  ;;  %v1468_v45 = vmul.f32 %v1307_v55, %v1307_v55  ;;  %v1310_v34 = vadd.f32 %v3036_v1, %v1076_v32  ;;  %v1078_v41 = vpop.f32.mrb[67].mxu1  ;;  %v3078_v5 = vpop.f32.mrb[94].mxu0 }
 0x1b0   : > { %v2264_v8 = vpop.f32.mrb[95].mxu0 }
 0x1b1   : > { %v1517_v37 = vadd.f32 %v1516_v25, %v1468_v45  ;;  %v1410_v38 = vadd.f32 %v1409_v52, %v1310_v34  ;;  %v1469_v40 = vmul.f32 %v1310_v34, %v1310_v34  ;;  %v1560_v39 = vpack.c.bf16 %v1310_v34, %v1307_v55 }
 0x1b3   : > { %v1518_v43 = vadd.f32 %v1517_v37, %v1469_v40  ;;  %1589 = vst [vmem:[#allocation2 + $0x80] sm:$0xff] %v1560_v39 }
 0x1b4   : > { %v1081_v47 = vpop.f32.mrb[68].mxu1 }
 0x1b5   : > { %v1315_v7 = vadd.f32 %v3040_v4, %v1081_v47  ;;  %v1083_v51 = vpop.f32.mrb[69].mxu1  ;;  %v3082_v26 = vpop.f32.mrb[96].mxu0 }
 0x1b6   : > { %v1084_v54 = vpop.f32.mrb[70].mxu1  ;;  %v2267_v29 = vpop.f32.mrb[97].mxu0 }
 0x1b7   : > { %v1411_v2 = vadd.f32 %v1410_v38, %v1315_v7  ;;  %v1470_v1 = vmul.f32 %v1315_v7, %v1315_v7  ;;  %v1318_v57 = vadd.f32 %v3042_v19, %v1084_v54  ;;  %v1086_v46 = vpop.f32.mrb[71].mxu1  ;;  %v3084_v22 = vpop.f32.mrb[98].mxu0 }
 0x1b8   : > { %v2268_v24 = vpop.f32.mrb[99].mxu0 }
 0x1b9   : > { %v1519_v60 = vadd.f32 %v1518_v43, %v1470_v1  ;;  %v1412_v61 = vadd.f32 %v1411_v2, %v1318_v57  ;;  %v1471_v62 = vmul.f32 %v1318_v57, %v1318_v57  ;;  %v1561_v44 = vpack.c.bf16 %v1318_v57, %v1315_v7 }
 0x1bb   : > { %v1520_v0 = vadd.f32 %v1519_v60, %v1471_v62  ;;  %1590 = vst [vmem:[#allocation2 + $0x88] sm:$0xff] %v1561_v44 }
 0x1bc   : > { %v1089_v3 = vpop.f32.mrb[72].mxu1 }
 0x1bd   : > { %v1323_v4 = vadd.f32 %v3046_v42, %v1089_v3  ;;  %v1091_v6 = vpop.f32.mrb[73].mxu1 }
 0x1be   : > { %v1092_v9 = vpop.f32.mrb[74].mxu1 }
 0x1bf   : > { %v1413_v20 = vadd.f32 %v1412_v61, %v1323_v4  ;;  %v1472_v19 = vmul.f32 %v1323_v4, %v1323_v4  ;;  %v1326_v11 = vadd.f32 %v3048_v35, %v1092_v9  ;;  %v1094_v50 = vpop.f32.mrb[75].mxu1 }
 0x1c1   : > { %v1521_v14 = vadd.f32 %v1520_v0, %v1472_v19  ;;  %v1414_v15 = vadd.f32 %v1413_v20, %v1326_v11  ;;  %v1473_v16 = vmul.f32 %v1326_v11, %v1326_v11  ;;  %v1562_v48 = vpack.c.bf16 %v1326_v11, %v1323_v4 }
 0x1c3   : > { %v1522_v18 = vadd.f32 %v1521_v14, %v1473_v16  ;;  %1591 = vst [vmem:[#allocation2 + $0x90] sm:$0xff] %v1562_v48 }
 0x1c4   : > { %v1097_v21 = vpop.f32.mrb[76].mxu1 }
 0x1c5   : > { %v1331_v42 = vadd.f32 %v3052_v63, %v1097_v21  ;;  %v1099_v23 = vpop.f32.mrb[77].mxu1 }
 0x1c6   : > { %v1100_v25 = vpop.f32.mrb[78].mxu1 }
 0x1c7   : > { %v1415_v36 = vadd.f32 %v1414_v15, %v1331_v42  ;;  %v1474_v35 = vmul.f32 %v1331_v42, %v1331_v42  ;;  %v1334_v27 = vadd.f32 %v3054_v58, %v1100_v25  ;;  %v1102_v55 = vpop.f32.mrb[79].mxu1 }
 0x1c9   : > { %v1523_v30 = vadd.f32 %v1522_v18, %v1474_v35  ;;  %v1416_v31 = vadd.f32 %v1415_v36, %v1334_v27  ;;  %v1475_v32 = vmul.f32 %v1334_v27, %v1334_v27  ;;  %v1563_v52 = vpack.c.bf16 %v1334_v27, %v1331_v42 }
 0x1cb   : > { %v1524_v45 = vadd.f32 %v1523_v30, %v1475_v32  ;;  %1592 = vst [vmem:[#allocation2 + $0x98] sm:$0xff] %v1563_v52 }
 0x1cc   : > { %v1105_v34 = vpop.f32.mrb[80].mxu1 }
 0x1cd   : > { %v1339_v41 = vadd.f32 %v3058_v17, %v1105_v34  ;;  %v1107_v37 = vpop.f32.mrb[81].mxu1 }
 0x1ce   : > { %v1108_v38 = vpop.f32.mrb[82].mxu1 }
 0x1cf   : > { %v1417_v63 = vadd.f32 %v1416_v31, %v1339_v41  ;;  %v1476_v40 = vmul.f32 %v1339_v41, %v1339_v41  ;;  %v1342_v39 = vadd.f32 %v3060_v12, %v1108_v38  ;;  %v1110_v43 = vpop.f32.mrb[83].mxu1 }
 0x1d1   : > { %v1525_v59 = vadd.f32 %v1524_v45, %v1476_v40  ;;  %v1418_v47 = vadd.f32 %v1417_v63, %v1342_v39  ;;  %v1477_v58 = vmul.f32 %v1342_v39, %v1342_v39  ;;  %v1564_v7 = vpack.c.bf16 %v1342_v39, %v1339_v41 }
 0x1d3   : > { %v1526_v51 = vadd.f32 %v1525_v59, %v1477_v58  ;;  %1593 = vst [vmem:[#allocation2 + $0xa0] sm:$0xff] %v1564_v7  ;;  %v1377_v7 = vld [vmem:[#allocation3] sm:$0x1] }
 0x1d4   : > { %v1113_v53 = vpop.f32.mrb[84].mxu1 }
 0x1d5   : > { %v1347_v54 = vadd.f32 %v3064_v33, %v1113_v53  ;;  %v1115_v2 = vpop.f32.mrb[85].mxu1 }
 0x1d6   : > { %v1116_v1 = vpop.f32.mrb[86].mxu1 }
 0x1d7   : > { %v1419_v57 = vadd.f32 %v1418_v47, %v1347_v54  ;;  %v1478_v17 = vmul.f32 %v1347_v54, %v1347_v54  ;;  %v1350_v46 = vadd.f32 %v3066_v28, %v1116_v1  ;;  %v1118_v60 = vpop.f32.mrb[87].mxu1 }
 0x1d9   : > { %v1527_v61 = vadd.f32 %v1526_v51, %v1478_v17  ;;  %v1420_v62 = vadd.f32 %v1419_v57, %v1350_v46  ;;  %v1479_v12 = vmul.f32 %v1350_v46, %v1350_v46  ;;  %v1565_v44 = vpack.c.bf16 %v1350_v46, %v1347_v54 }
 0x1db   : > { %v1528_v0 = vadd.f32 %v1527_v61, %v1479_v12  ;;  %1594 = vst [vmem:[#allocation2 + $0xa8] sm:$0xff] %v1565_v44 }
 0x1dc   : > { %v1121_v13 = vpop.f32.mrb[88].mxu1 }
 0x1dd   : > { %v1355_v3 = vadd.f32 %v3070_v56, %v1121_v13  ;;  %v1123_v4 = vpop.f32.mrb[89].mxu1 }
 0x1de   : > { %v1124_v6 = vpop.f32.mrb[90].mxu1 }
 0x1df   : > { %v1421_v8 = vadd.f32 %v1420_v62, %v1355_v3  ;;  %v1480_v33 = vmul.f32 %v1355_v3, %v1355_v3  ;;  %v1358_v9 = vadd.f32 %v3072_v49, %v1124_v6  ;;  %v1126_v20 = vpop.f32.mrb[91].mxu1 }
 0x1e1   : > { %v1529_v19 = vadd.f32 %v1528_v0, %v1480_v33  ;;  %v1422_v11 = vadd.f32 %v1421_v8, %v1358_v9  ;;  %v1481_v28 = vmul.f32 %v1358_v9, %v1358_v9  ;;  %v1566_v50 = vpack.c.bf16 %v1358_v9, %v1355_v3 }
 0x1e3   : > { %v1530_v14 = vadd.f32 %v1529_v19, %v1481_v28  ;;  %1595 = vst [vmem:[#allocation2 + $0xb0] sm:$0xff] %v1566_v50 }
 0x1e4   : > { %v1129_v15 = vpop.f32.mrb[92].mxu1 }
 0x1e5   : > { %v1363_v16 = vadd.f32 %v3076_v10, %v1129_v15  ;;  %v1131_v48 = vpop.f32.mrb[93].mxu1 }
 0x1e6   : > { %v1132_v18 = vpop.f32.mrb[94].mxu1 }
 0x1e7   : > { %v1423_v29 = vadd.f32 %v1422_v11, %v1363_v16  ;;  %v1482_v56 = vmul.f32 %v1363_v16, %v1363_v16  ;;  %v1366_v21 = vadd.f32 %v3078_v5, %v1132_v18  ;;  %v1134_v42 = vpop.f32.mrb[95].mxu1 }
 0x1e9   : > { %v1531_v23 = vadd.f32 %v1530_v14, %v1482_v56  ;;  %v1424_v24 = vadd.f32 %v1423_v29, %v1366_v21  ;;  %v1483_v49 = vmul.f32 %v1366_v21, %v1366_v21  ;;  %v1567_v25 = vpack.c.bf16 %v1366_v21, %v1363_v16 }
 0x1eb   : > { %v1532_v36 = vadd.f32 %v1531_v23, %v1483_v49  ;;  %1596 = vst [vmem:[#allocation2 + $0xb8] sm:$0xff] %v1567_v25 }
 0x1ec   : > { %v1137_v35 = vpop.f32.mrb[96].mxu1 }
 0x1ed   : > { %v1371_v27 = vadd.f32 %v3082_v26, %v1137_v35  ;;  %v1139_v55 = vpop.f32.mrb[97].mxu1 }
 0x1ee   : > { %v1140_v30 = vpop.f32.mrb[98].mxu1 }
 0x1ef   : > { %v1425_v31 = vadd.f32 %v1424_v24, %v1371_v27  ;;  %v1484_v10 = vmul.f32 %v1371_v27, %v1371_v27  ;;  %v1374_v32 = vadd.f32 %v3084_v22, %v1140_v30  ;;  %v1142_v52 = vpop.f32.mrb[99].mxu1  ;;  %v1435_v22 = vld [vmem:[#allocation4] sm:$0x1] }
 0x1f1   : > { %v1533_v45 = vadd.f32 %v1532_v36, %v1484_v10  ;;  %v1426_v34 = vadd.f32 %v1425_v31, %v1374_v32  ;;  %v1485_v5 = vmul.f32 %v1374_v32, %v1374_v32  ;;  %v1568_v41 = vpack.c.bf16 %v1374_v32, %v1371_v27 }
 0x1f3   : > { %v1427_v37 = vrot.slane %v1426_v34, 4  ;;  %v1534_v38 = vadd.f32 %v1533_v45, %v1485_v5  ;;  %1597 = vst [vmem:[#allocation2 + $0xc0] sm:$0xff] %v1568_v41 }
 0x1f5   : > { %v1428_v63 = vadd.f32 %v1427_v37, %v1426_v34  ;;  %v1535_v40 = vrot.slane %v1534_v38, 4 }
 0x1f7   : > { %v1429_v39 = vrot.slane %v1428_v63, 2  ;;  %v1536_v43 = vadd.f32 %v1535_v40, %v1534_v38 }
 0x1f9   : > { %v1430_v59 = vadd.f32 %v1429_v39, %v1428_v63  ;;  %v1537_v26 = vrot.slane %v1536_v43, 2 }
 0x1fb   : > { %v1431_v47 = vrot.slane %v1430_v59, 1  ;;  %v1538_v58 = vadd.f32 %v1537_v26, %v1536_v43 }
 0x1fd   : > { %v1432_v51 = vadd.f32 %v1431_v47, %v1430_v59  ;;  %v1539_v53 = vrot.slane %v1538_v58, 1 }
 0x1ff   : > { %v1433_v54 = vadd.f32 %v1432_v51, %v1377_v7  ;;  %v1540_v2 = vadd.f32 %v1539_v53, %v1538_v58 }
 0x201   : > { %1434 = vst [vmem:[#allocation3] sm:$0x1] %v1433_v54  ;;  %v1541_v1 = vadd.f32 %v1540_v2, %v1435_v22 }
 0x203   : > { %1542 = vst [vmem:[#allocation4] sm:$0x1] %v1541_v1 }
 0x204 PF: > { %1599 = sbr.rel (!%p205_p4) target bundleno = 798 (0x31e), region = 44  ;;  %s2542_s9 = smov (%p205_p4), 64   ;;  %v1633_v50 = vld [vmem:[%s3261_s2] sm:$0x1] (%p205_p4)  ;;  %v1637_v16 = vld [vmem:[%s3261_s2 + $0x1] sm:$0x1] (%p205_p4) }
 0x205   : > { %s2543_s10 = smov (%p205_p4), 96   ;;  %s2544_s11 = smov (%p205_p4), 32   ;;  %vm1650_vm2 = vcmask (%p205_p4), 261120   ;;  %vm1652_vm3 = vcmask (%p205_p4), 523264   ;;  %vm1654_vm4 = vcmask (%p205_p4), 785408  }
 0x208   : > { %v1600_v57 = vld [vmem:[#allocation3] sm:$0x1] (%p205_p4) }
 0x209   : > { %1612 = vrot.lane.b32.xlu1 (%p205_p4), %v1600_v57, %s2542_s9  ;;  %1603 = vrot.lane.b32.xlu0 (%p205_p4), %v1600_v57, %s2543_s10 }
 0x20a   : > { %v1601_v17 = vld [vmem:[#allocation4] sm:$0x1] (%p205_p4) }
 0x20d   : > { %1616 = vrot.lane.b32.xlu1 %v1601_v17, %s2542_s9  ;;  %1608 = vrot.lane.b32.xlu0 %v1601_v17, %s2543_s10 }
 0x211   : > { %1624 = vrot.lane.b32.xlu1 %v1601_v17, %s2544_s11  ;;  %1620 = vrot.lane.b32.xlu0 %v1600_v57, %s2544_s11 }
 0x27b   : > { %v1613_v46 = vpop.permute.xlu1 %1612  ;;  %v1604_v60 = vpop.permute.xlu0 %1603 }
 0x27c   : > { %v1606_v61 = vadd.f32 %v1604_v60, %v1600_v57 }
 0x27e   : > { %v1615_v13 = vadd.f32 %v1613_v46, %v1606_v61 }
 0x27f   : > { %v1617_v62 = vpop.permute.xlu1 %1616  ;;  %v1609_v12 = vpop.permute.xlu0 %1608 }
 0x280   : > { %v1611_v44 = vadd.f32 %v1609_v12, %v1601_v17 }
 0x282   : > { %v1619_v0 = vadd.f32 %v1617_v62, %v1611_v44 }
 0x283   : > { %v1625_v3 = vpop.permute.xlu1 %1624  ;;  %v1621_v4 = vpop.permute.xlu0 %1620 }
 0x284   : > { %v1627_v6 = vadd.f32 %v1625_v3, %v1619_v0  ;;  %v1623_v8 = vadd.f32 %v1621_v4, %v1615_v13 }
 0x286   : > { %v1628_v33 = vmul.f32 0.0006377551, %v1623_v8  ;;  %v1629_v9 = vmul.f32 0.0006377551, %v1627_v6 }
 0x288   : > { %v1630_v20 = vmul.f32 %v1628_v33, %v1628_v33 }
 0x28a   : > { %v1631_v19 = vsub.f32 %v1629_v9, %v1630_v20 }
 0x28c   : > { %v1632_v11 = vmax.f32 %v1631_v19, 0.0 }
 0x28e   : > { %v1634_v28 = vadd.f32 1e-05, %v1632_v11 }
 0x290   : > { %2482 = vrsqrt.f32 %v1634_v28 }
 0x29a   : > { %v2483_v14 = vpop.eup %2482 }
 0x29b   : > { %v1636_v15 = vmul.f32 %v2483_v14, %v1633_v50 }
 0x29d   : > { %v1638_v48 = vmul.f32 %v1636_v15, %v1628_v33  ;;  %1641 = vrot.lane.b32.xlu0 %v1636_v15, %s2544_s11 }
 0x29f   : > { %v1639_v18 = vsub.f32 %v1637_v16, %v1638_v48 }
 0x2a1   : > { %1644 = vrot.lane.b32.xlu0 %v1636_v15, %s2542_s9  ;;  %1658 = vrot.lane.b32.xlu1 %v1639_v18, %s2544_s11 }
 0x2a5   : > { %1647 = vrot.lane.b32.xlu0 %v1636_v15, %s2543_s10  ;;  %1661 = vrot.lane.b32.xlu1 %v1639_v18, %s2542_s9 }
 0x2a9   : > { %1664 = vrot.lane.b32.xlu1 %v1639_v18, %s2543_s10 }
 0x30f   : > { %v1642_v29 = vpop.permute.xlu0 %1641 }
 0x310   : > { %v1651_v42 = vsel %vm1650_vm2, %v1636_v15, %v1642_v29 }
 0x313   : > { %v1645_v56 = vpop.permute.xlu0 %1644  ;;  %v1659_v21 = vpop.permute.xlu1 %1658 }
 0x314   : > { %v1653_v23 = vsel %vm1652_vm3, %v1651_v42, %v1645_v56  ;;  %v1667_v36 = vsel %vm1650_vm2, %v1639_v18, %v1659_v21 }
 0x317   : > { %v1648_v24 = vpop.permute.xlu0 %1647  ;;  %v1662_v49 = vpop.permute.xlu1 %1661 }
 0x318   : > { %v1655_v25 = vsel %vm1654_vm4, %v1653_v23, %v1648_v24  ;;  %v1668_v35 = vsel %vm1652_vm3, %v1667_v36, %v1662_v49 }
 0x319   : > { %1656 = vst [vmem:[#allocation5] sm:$0x1] %v1655_v25 }
 0x31b   : > { %v1665_v27 = vpop.permute.xlu1 %1664 }
 0x31c   : > { %v1669_v55 = vsel %vm1654_vm4, %v1668_v35, %v1665_v27 }
 0x31d   : > { %1670 = vst [vmem:[#allocation5 + $0x1] sm:$0x1] %v1669_v55 }
 0x31e PF: > { %p2130_p6 = scmp.ne.s32.totalorder %s2528_s12, 1 }
 0x31f   : > { %v1680_v30 = vld [vmem:[#allocation2] sm:$0xff] (!%p2130_p6)  ;;  %v1681_v52 = vld [vmem:[#allocation2 + $0x8] sm:$0xff] (!%p2130_p6)  ;;  %v1682_v45 = vld [vmem:[#allocation2 + $0x10] sm:$0xff] (!%p2130_p6) }
 0x320   : > { %1674 = sbr.rel (%p2130_p6) target bundleno = 842 (0x34a), region = 48  ;;  %v3119_v31 = vld [vmem:[#allocation5] ss:$0 sm:$0xff] (!%p2130_p6)  ;;  %v1705_v10 = vunpack.c.l.bf16 (!%p2130_p6), %v1680_v30  ;;  %v1706_v32 = vunpack.c.h.bf16 (!%p2130_p6), %v1680_v30  ;;  %v1683_v34 = vld [vmem:[#allocation2 + $0x18] sm:$0xff] (!%p2130_p6)  ;;  %v1707_v41 = vunpack.c.l.bf16 (!%p2130_p6), %v1681_v52  ;;  %v1708_v37 = vunpack.c.h.bf16 (!%p2130_p6), %v1681_v52  ;;  %v1684_v51 = vld [vmem:[#allocation2 + $0x20] sm:$0xff] (!%p2130_p6) }
 0x321   : > { %v1709_v38 = vunpack.c.l.bf16 (!%p2130_p6), %v1682_v45  ;;  %v1710_v63 = vunpack.c.h.bf16 (!%p2130_p6), %v1682_v45  ;;  %v1711_v43 = vunpack.c.l.bf16 (!%p2130_p6), %v1683_v34  ;;  %v1712_v59 = vunpack.c.h.bf16 (!%p2130_p6), %v1683_v34  ;;  %v1685_v1 = vld [vmem:[#allocation2 + $0x28] sm:$0xff] (!%p2130_p6)  ;;  %v1686_v57 = vld [vmem:[#allocation2 + $0x30] sm:$0xff] (!%p2130_p6)  ;;  %v1687_v62 = vld [vmem:[#allocation2 + $0x38] sm:$0xff] (!%p2130_p6) }
 0x322   : > { %v1760_v40 = vmul.f32 (!%p2130_p6), %v3119_v31, %v1705_v10  ;;  %v1761_v39 = vmul.f32 (!%p2130_p6), %v3119_v31, %v1706_v32  ;;  %v1762_v26 = vmul.f32 (!%p2130_p6), %v3119_v31, %v1707_v41  ;;  %v1763_v47 = vmul.f32 (!%p2130_p6), %v3119_v31, %v1708_v37  ;;  %v1688_v15 = vld [vmem:[#allocation2 + $0x40] sm:$0xff] (!%p2130_p6)  ;;  %v1689_v56 = vld [vmem:[#allocation2 + $0x48] sm:$0xff] (!%p2130_p6)  ;;  %v1690_v21 = vld [vmem:[#allocation2 + $0x50] sm:$0xff] (!%p2130_p6) }
 0x323   : > { %v1764_v58 = vmul.f32 (!%p2130_p6), %v3119_v31, %v1709_v38  ;;  %v1765_v7 = vmul.f32 (!%p2130_p6), %v3119_v31, %v1710_v63  ;;  %v1766_v54 = vmul.f32 (!%p2130_p6), %v3119_v31, %v1711_v43  ;;  %v1767_v2 = vmul.f32 (!%p2130_p6), %v3119_v31, %v1712_v59  ;;  %v1691_v25 = vld [vmem:[#allocation2 + $0x58] sm:$0xff] (!%p2130_p6)  ;;  %v1692_v43 = vld [vmem:[#allocation2 + $0x60] sm:$0xff] (!%p2130_p6) }
 0x324   : > { %v3121_v5 = vld [vmem:[#allocation5 + $0x1] ss:$0 sm:$0xff] (!%p2130_p6)  ;;  %v1713_v0 = vunpack.c.l.bf16 (!%p2130_p6), %v1684_v51  ;;  %v1714_v13 = vunpack.c.h.bf16 (!%p2130_p6), %v1684_v51  ;;  %v1715_v3 = vunpack.c.l.bf16 (!%p2130_p6), %v1685_v1  ;;  %v1716_v4 = vunpack.c.h.bf16 (!%p2130_p6), %v1685_v1  ;;  %v1694_v51 = vld [vmem:[#allocation2 + $0x70] sm:$0xff] (!%p2130_p6)  ;;  %v1695_v1 = vld [vmem:[#allocation2 + $0x78] sm:$0xff] (!%p2130_p6) }
 0x325   : > { %v1815_v53 = vadd.f32 (!%p2130_p6), %v3121_v5, %v1760_v40  ;;  %v1816_v22 = vadd.f32 (!%p2130_p6), %v3121_v5, %v1761_v39  ;;  %v1817_v17 = vadd.f32 (!%p2130_p6), %v3121_v5, %v1762_v26  ;;  %v1818_v46 = vadd.f32 (!%p2130_p6), %v3121_v5, %v1763_v47 }
 0x326   : > { %v1819_v60 = vadd.f32 (!%p2130_p6), %v3121_v5, %v1764_v58  ;;  %v1820_v61 = vadd.f32 (!%p2130_p6), %v3121_v5, %v1765_v7  ;;  %v1821_v12 = vadd.f32 (!%p2130_p6), %v3121_v5, %v1766_v54  ;;  %v1822_v44 = vadd.f32 (!%p2130_p6), %v3121_v5, %v1767_v2  ;;  %v1693_v7 = vld [vmem:[#allocation2 + $0x68] sm:$0xff] (!%p2130_p6) }
 0x327   : > { %1865 = vst [vmem:[#allocation6] sm:$0xff] %v1815_v53  ;;  %1866 = vst [vmem:[#allocation6 + $0x8] sm:$0xff] %v1816_v22  ;;  %v1717_v6 = vunpack.c.l.bf16 %v1686_v57  ;;  %v1718_v8 = vunpack.c.h.bf16 %v1686_v57  ;;  %v1768_v33 = vmul.f32 %v3119_v31, %v1713_v0  ;;  %v1769_v9 = vmul.f32 %v3119_v31, %v1714_v13 }
 0x328   : > { %1867 = vst [vmem:[#allocation6 + $0x10] sm:$0xff] %v1817_v17  ;;  %1868 = vst [vmem:[#allocation6 + $0x18] sm:$0xff] %v1818_v46  ;;  %v1719_v20 = vunpack.c.l.bf16 %v1687_v62  ;;  %v1720_v19 = vunpack.c.h.bf16 %v1687_v62  ;;  %v1770_v11 = vmul.f32 %v3119_v31, %v1715_v3  ;;  %v1771_v28 = vmul.f32 %v3119_v31, %v1716_v4 }
 0x329   : > { %1869 = vst [vmem:[#allocation6 + $0x20] sm:$0xff] %v1819_v60  ;;  %1870 = vst [vmem:[#allocation6 + $0x28] sm:$0xff] %v1820_v61  ;;  %v1772_v50 = vmul.f32 %v3119_v31, %v1717_v6  ;;  %v1773_v14 = vmul.f32 %v3119_v31, %v1718_v8  ;;  %v1823_v16 = vadd.f32 %v3121_v5, %v1768_v33  ;;  %v1721_v27 = vunpack.c.l.bf16 %v1688_v15 }
 0x32a   : > { %1871 = vst [vmem:[#allocation6 + $0x30] sm:$0xff] %v1821_v12  ;;  %1872 = vst [vmem:[#allocation6 + $0x38] sm:$0xff] %v1822_v44  ;;  %v1824_v48 = vadd.f32 %v3121_v5, %v1769_v9  ;;  %v1774_v18 = vmul.f32 %v3119_v31, %v1719_v20  ;;  %v1775_v29 = vmul.f32 %v3119_v31, %v1720_v19  ;;  %v1722_v55 = vunpack.c.h.bf16 %v1688_v15  ;;  %v1696_v20 = vld [vmem:[#allocation2 + $0x80] sm:$0xff]  ;;  %v1698_v15 = vld [vmem:[#allocation2 + $0x90] sm:$0xff] }
 0x32b   : > { %v1825_v42 = vadd.f32 %v3121_v5, %v1770_v11  ;;  %v1826_v23 = vadd.f32 %v3121_v5, %v1771_v28  ;;  %v1827_v24 = vadd.f32 %v3121_v5, %v1772_v50  ;;  %v1828_v49 = vadd.f32 %v3121_v5, %v1773_v14  ;;  %1873 = vst [vmem:[#allocation6 + $0x40] sm:$0xff] %v1823_v16  ;;  %v1697_v14 = vld [vmem:[#allocation2 + $0x88] sm:$0xff] }
 0x32c   : > { %1874 = vst [vmem:[#allocation6 + $0x48] sm:$0xff] %v1824_v48  ;;  %v1829_v36 = vadd.f32 %v3121_v5, %v1774_v18  ;;  %v1830_v35 = vadd.f32 %v3121_v5, %v1775_v29  ;;  %v1723_v30 = vunpack.c.l.bf16 %v1689_v56  ;;  %v1724_v10 = vunpack.c.h.bf16 %v1689_v56  ;;  %v1699_v56 = vld [vmem:[#allocation2 + $0x98] sm:$0xff] }
 0x32d   : > { %1875 = vst [vmem:[#allocation6 + $0x50] sm:$0xff] %v1825_v42  ;;  %1876 = vst [vmem:[#allocation6 + $0x58] sm:$0xff] %v1826_v23  ;;  %v1725_v32 = vunpack.c.l.bf16 %v1690_v21  ;;  %v1726_v52 = vunpack.c.h.bf16 %v1690_v21  ;;  %v1776_v45 = vmul.f32 %v3119_v31, %v1721_v27  ;;  %v1777_v34 = vmul.f32 %v3119_v31, %v1722_v55 }
 0x32e   : > { %1877 = vst [vmem:[#allocation6 + $0x60] sm:$0xff] %v1827_v24  ;;  %1878 = vst [vmem:[#allocation6 + $0x68] sm:$0xff] %v1828_v49  ;;  %v1727_v41 = vunpack.c.l.bf16 %v1691_v25  ;;  %v1728_v37 = vunpack.c.h.bf16 %v1691_v25  ;;  %v1778_v38 = vmul.f32 %v3119_v31, %v1723_v30  ;;  %v1779_v63 = vmul.f32 %v3119_v31, %v1724_v10 }
 0x32f   : > { %1879 = vst [vmem:[#allocation6 + $0x70] sm:$0xff] %v1829_v36  ;;  %1880 = vst [vmem:[#allocation6 + $0x78] sm:$0xff] %v1830_v35  ;;  %v1780_v40 = vmul.f32 %v3119_v31, %v1725_v32  ;;  %v1781_v39 = vmul.f32 %v3119_v31, %v1726_v52  ;;  %v1831_v59 = vadd.f32 %v3121_v5, %v1776_v45  ;;  %v1729_v46 = vunpack.c.l.bf16 %v1692_v43 }
 0x330   : > { %v1832_v26 = vadd.f32 %v3121_v5, %v1777_v34  ;;  %v1782_v47 = vmul.f32 %v3119_v31, %v1727_v41  ;;  %v1783_v58 = vmul.f32 %v3119_v31, %v1728_v37  ;;  %v1833_v53 = vadd.f32 %v3121_v5, %v1778_v38  ;;  %v1700_v41 = vld [vmem:[#allocation2 + $0xa0] sm:$0xff] }
 0x331   : > { %v1834_v22 = vadd.f32 %v3121_v5, %v1779_v63  ;;  %v1835_v54 = vadd.f32 %v3121_v5, %v1780_v40  ;;  %v1836_v2 = vadd.f32 %v3121_v5, %v1781_v39  ;;  %1881 = vst [vmem:[#allocation6 + $0x80] sm:$0xff] %v1831_v59  ;;  %v1730_v60 = vunpack.c.h.bf16 %v1692_v43  ;;  %v1701_v39 = vld [vmem:[#allocation2 + $0xa8] sm:$0xff]  ;;  %v1702_v43 = vld [vmem:[#allocation2 + $0xb0] sm:$0xff] }
 0x332   : > { %1882 = vst [vmem:[#allocation6 + $0x88] sm:$0xff] %v1832_v26  ;;  %v1837_v57 = vadd.f32 %v3121_v5, %v1782_v47  ;;  %v1838_v17 = vadd.f32 %v3121_v5, %v1783_v58  ;;  %1883 = vst [vmem:[#allocation6 + $0x90] sm:$0xff] %v1833_v53  ;;  %v1731_v61 = vunpack.c.l.bf16 %v1693_v7  ;;  %v1732_v62 = vunpack.c.h.bf16 %v1693_v7  ;;  %v1703_v7 = vld [vmem:[#allocation2 + $0xb8] sm:$0xff] }
 0x333   : > { %1884 = vst [vmem:[#allocation6 + $0x98] sm:$0xff] %v1834_v22  ;;  %1885 = vst [vmem:[#allocation6 + $0xa0] sm:$0xff] %v1835_v54  ;;  %v1733_v12 = vunpack.c.l.bf16 %v1694_v51  ;;  %v1734_v44 = vunpack.c.h.bf16 %v1694_v51  ;;  %v1784_v0 = vmul.f32 %v3119_v31, %v1729_v46  ;;  %v1785_v13 = vmul.f32 %v3119_v31, %v1730_v60 }
 0x334   : > { %1886 = vst [vmem:[#allocation6 + $0xa8] sm:$0xff] %v1836_v2  ;;  %1887 = vst [vmem:[#allocation6 + $0xb0] sm:$0xff] %v1837_v57  ;;  %v1735_v3 = vunpack.c.l.bf16 %v1695_v1  ;;  %v1736_v4 = vunpack.c.h.bf16 %v1695_v1  ;;  %v1786_v6 = vmul.f32 %v3119_v31, %v1731_v61  ;;  %v1787_v8 = vmul.f32 %v3119_v31, %v1732_v62 }
 0x335   : > { %1888 = vst [vmem:[#allocation6 + $0xb8] sm:$0xff] %v1838_v17  ;;  %v1788_v33 = vmul.f32 %v3119_v31, %v1733_v12  ;;  %v1789_v9 = vmul.f32 %v3119_v31, %v1734_v44  ;;  %v1839_v19 = vadd.f32 %v3121_v5, %v1784_v0  ;;  %v1840_v11 = vadd.f32 %v3121_v5, %v1785_v13 }
 0x336   : > { %v1790_v28 = vmul.f32 %v3119_v31, %v1735_v3  ;;  %v1791_v50 = vmul.f32 %v3119_v31, %v1736_v4  ;;  %v1841_v16 = vadd.f32 %v3121_v5, %v1786_v6  ;;  %v1842_v48 = vadd.f32 %v3121_v5, %v1787_v8  ;;  %v1704_v3 = vld [vmem:[#allocation2 + $0xc0] sm:$0xff] }
 0x337   : > { %v1843_v18 = vadd.f32 %v3121_v5, %v1788_v33  ;;  %v1844_v29 = vadd.f32 %v3121_v5, %v1789_v9  ;;  %1889 = vst [vmem:[#allocation6 + $0xc0] sm:$0xff] %v1839_v19  ;;  %1890 = vst [vmem:[#allocation6 + $0xc8] sm:$0xff] %v1840_v11  ;;  %v1737_v23 = vunpack.c.l.bf16 %v1696_v20  ;;  %v1738_v24 = vunpack.c.h.bf16 %v1696_v20 }
 0x338   : > { %v1845_v21 = vadd.f32 %v3121_v5, %v1790_v28  ;;  %v1846_v42 = vadd.f32 %v3121_v5, %v1791_v50  ;;  %1891 = vst [vmem:[#allocation6 + $0xd0] sm:$0xff] %v1841_v16  ;;  %1892 = vst [vmem:[#allocation6 + $0xd8] sm:$0xff] %v1842_v48  ;;  %v1739_v49 = vunpack.c.l.bf16 %v1697_v14  ;;  %v1740_v25 = vunpack.c.h.bf16 %v1697_v14 }
 0x339   : > { %1893 = vst [vmem:[#allocation6 + $0xe0] sm:$0xff] %v1843_v18  ;;  %1894 = vst [vmem:[#allocation6 + $0xe8] sm:$0xff] %v1844_v29  ;;  %v1741_v36 = vunpack.c.l.bf16 %v1698_v15  ;;  %v1742_v35 = vunpack.c.h.bf16 %v1698_v15  ;;  %v1792_v27 = vmul.f32 %v3119_v31, %v1737_v23  ;;  %v1793_v55 = vmul.f32 %v3119_v31, %v1738_v24 }
 0x33a   : > { %1895 = vst [vmem:[#allocation6 + $0xf0] sm:$0xff] %v1845_v21  ;;  %1896 = vst [vmem:[#allocation6 + $0xf8] sm:$0xff] %v1846_v42  ;;  %v1743_v30 = vunpack.c.l.bf16 %v1699_v56  ;;  %v1744_v10 = vunpack.c.h.bf16 %v1699_v56  ;;  %v1794_v32 = vmul.f32 %v3119_v31, %v1739_v49  ;;  %v1795_v52 = vmul.f32 %v3119_v31, %v1740_v25 }
 0x33b   : > { %v1796_v45 = vmul.f32 %v3119_v31, %v1741_v36  ;;  %v1797_v34 = vmul.f32 %v3119_v31, %v1742_v35  ;;  %v1847_v37 = vadd.f32 %v3121_v5, %v1792_v27  ;;  %v1848_v38 = vadd.f32 %v3121_v5, %v1793_v55 }
 0x33c   : > { %v1798_v63 = vmul.f32 %v3119_v31, %v1743_v30  ;;  %v1799_v40 = vmul.f32 %v3119_v31, %v1744_v10  ;;  %v1849_v59 = vadd.f32 %v3121_v5, %v1794_v32  ;;  %v1850_v26 = vadd.f32 %v3121_v5, %v1795_v52 }
 0x33d   : > { %v1851_v47 = vadd.f32 %v3121_v5, %v1796_v45  ;;  %v1852_v58 = vadd.f32 %v3121_v5, %v1797_v34  ;;  %1897 = vst [vmem:[#allocation6 + $0x100] sm:$0xff] %v1847_v37  ;;  %1898 = vst [vmem:[#allocation6 + $0x108] sm:$0xff] %v1848_v38  ;;  %v1745_v22 = vunpack.c.l.bf16 %v1700_v41  ;;  %v1746_v54 = vunpack.c.h.bf16 %v1700_v41 }
 0x33e   : > { %v1853_v51 = vadd.f32 %v3121_v5, %v1798_v63  ;;  %v1854_v53 = vadd.f32 %v3121_v5, %v1799_v40  ;;  %1899 = vst [vmem:[#allocation6 + $0x110] sm:$0xff] %v1849_v59  ;;  %1900 = vst [vmem:[#allocation6 + $0x118] sm:$0xff] %v1850_v26  ;;  %v1747_v2 = vunpack.c.l.bf16 %v1701_v39  ;;  %v1748_v1 = vunpack.c.h.bf16 %v1701_v39 }
 0x33f   : > { %1901 = vst [vmem:[#allocation6 + $0x120] sm:$0xff] %v1851_v47  ;;  %1902 = vst [vmem:[#allocation6 + $0x128] sm:$0xff] %v1852_v58  ;;  %v1749_v57 = vunpack.c.l.bf16 %v1702_v43  ;;  %v1750_v17 = vunpack.c.h.bf16 %v1702_v43  ;;  %v1800_v46 = vmul.f32 %v3119_v31, %v1745_v22  ;;  %v1801_v60 = vmul.f32 %v3119_v31, %v1746_v54 }
 0x340   : > { %1903 = vst [vmem:[#allocation6 + $0x130] sm:$0xff] %v1853_v51  ;;  %1904 = vst [vmem:[#allocation6 + $0x138] sm:$0xff] %v1854_v53  ;;  %v1751_v61 = vunpack.c.l.bf16 %v1703_v7  ;;  %v1752_v62 = vunpack.c.h.bf16 %v1703_v7  ;;  %v1802_v12 = vmul.f32 %v3119_v31, %v1747_v2  ;;  %v1803_v44 = vmul.f32 %v3119_v31, %v1748_v1 }
 0x341   : > { %v1804_v0 = vmul.f32 %v3119_v31, %v1749_v57  ;;  %v1805_v13 = vmul.f32 %v3119_v31, %v1750_v17  ;;  %v1855_v4 = vadd.f32 %v3121_v5, %v1800_v46  ;;  %v1856_v6 = vadd.f32 %v3121_v5, %v1801_v60 }
 0x342   : > { %v1806_v8 = vmul.f32 %v3119_v31, %v1751_v61  ;;  %v1807_v33 = vmul.f32 %v3119_v31, %v1752_v62  ;;  %v1857_v9 = vadd.f32 %v3121_v5, %v1802_v12  ;;  %v1858_v20 = vadd.f32 %v3121_v5, %v1803_v44 }
 0x343   : > { %v1859_v19 = vadd.f32 %v3121_v5, %v1804_v0  ;;  %v1860_v11 = vadd.f32 %v3121_v5, %v1805_v13  ;;  %1905 = vst [vmem:[#allocation6 + $0x140] sm:$0xff] %v1855_v4  ;;  %1906 = vst [vmem:[#allocation6 + $0x148] sm:$0xff] %v1856_v6  ;;  %v1753_v14 = vunpack.c.l.bf16 %v1704_v3  ;;  %v1754_v15 = vunpack.c.h.bf16 %v1704_v3 }
 0x344   : > { %v1861_v28 = vadd.f32 %v3121_v5, %v1806_v8  ;;  %v1862_v50 = vadd.f32 %v3121_v5, %v1807_v33  ;;  %1907 = vst [vmem:[#allocation6 + $0x150] sm:$0xff] %v1857_v9  ;;  %1908 = vst [vmem:[#allocation6 + $0x158] sm:$0xff] %v1858_v20 }
 0x345   : > { %1909 = vst [vmem:[#allocation6 + $0x160] sm:$0xff] %v1859_v19  ;;  %1910 = vst [vmem:[#allocation6 + $0x168] sm:$0xff] %v1860_v11  ;;  %v1808_v16 = vmul.f32 %v3119_v31, %v1753_v14  ;;  %v1809_v48 = vmul.f32 %v3119_v31, %v1754_v15 }
 0x346   : > { %1911 = vst [vmem:[#allocation6 + $0x170] sm:$0xff] %v1861_v28  ;;  %1912 = vst [vmem:[#allocation6 + $0x178] sm:$0xff] %v1862_v50 }
 0x347   : > { %v1863_v18 = vadd.f32 %v3121_v5, %v1808_v16  ;;  %v1864_v29 = vadd.f32 %v3121_v5, %v1809_v48 }
 0x349   : > { %1913 = vst [vmem:[#allocation6 + $0x180] sm:$0xff] %v1863_v18  ;;  %1914 = vst [vmem:[#allocation6 + $0x188] sm:$0xff] %v1864_v29 }
 0x34a PF: > { %p3225_p7 = scmp.eq.s32.totalorder %s2004_s15, 1  ;;  %s2545_s22 = smov [#allocation6]  }
 0x34b   : > { %s1930_s23 = sshll.u32 %s2545_s22, 4  ;;  %s1931_s23 = int_to_ptr.vmem [resolvable:$true] %s1930_s23 }
 0x34c   : > { %s2484_s24 = scalar_lea.vmem %s1931_s23, 6400  ;;  %s2490_s25 = scalar_lea.vmem %s1931_s23, 12800 }
 0x34d   : > { %p2485_p8 = scmp.ne.s32.totalorder %s1931_s23, %s2484_s24  ;;  %p2491_p11 = scmp.lt.s32.totalorder %s1931_s23, %s1931_s23 }
 0x34e   : > { %p2492_p12 = scmp.lt.s32.totalorder %s2490_s25, %s2484_s24 }
 0x34f   : > { %p2486_p9 = pnand %p2485_p8, %p3225_p7 }
 0x350   : > { %p2493_p13 = por %p2492_p12, %p2491_p11 }
 0x351   : > { %p2487_p10 = pneg %p2486_p9 }
 0x353   : > { %p2494_p0 = pnand %p2493_p13, %p2487_p10 }
 0x355   : > { %2497 = shalt.err (!%p2494_p0)
}
 0x356   : > { %s2498_s27 = scalar_lea.hbm %s3262_s3, 6400 }
 0x357   : > { %p2499_p1 = scmp.ne.s32.totalorder %s3262_s3, %s2498_s27  ;;  %p2504_p4 = scmp.lt.u32.totalorder %s2498_s27, %s3262_s3 }
 0x359   : > { %p2500_p2 = pnand %p2499_p1, %p3225_p7 }
 0x35b   : > { %p2501_p3 = pneg %p2500_p2 }
 0x35d   : > { %p2506_p5 = pnand %p2504_p4, %p2501_p3 }
 0x35f   : > { %2509 = shalt.err (!%p2506_p5)
}
 0x360   : > { %s2546_s5 = smov 128   ;;  %s2547_s6 = smov 8  }
 0x361   : > { %2320 = dma.vmem_to_hbm [thread:$0]  (%p3225_p7), %s1931_s23, 6400, %s3262_s3, [#allocation7], %s2546_s5, %s2546_s5, %s2547_s6  }
 0x362 PF: > { %p2328_p6 = scmp.ge.s32.totalorder %s2536_s14, 2  ;;  %p2329_p8 = scmp.eq.s32.totalorder %s2005_s16, 1 }
 0x364   : > { %p2324_p9 = pnand %p2329_p8, %p2328_p6 }
 0x366   : > { %2523 = dma.done.wait (!%p2324_p9), [#allocation7], 6400  }
 0x367   : > { %2525 = vsyncadd (!%p2324_p9), [#allocation7], 4294960896  ;;  %s16_s14 = sadd.s32 1, %s2536_s14   ;;  %s3264_s12 = smov %s2532_s13 }
 0x368   : > { %p13_p10 = scmp.ge.s32.totalorder %s16_s14, 4   ;;  %s3265_s13 = smov %s3267_s17 }
 0x36a   :  { %15 = sbr.rel (!%p13_p10) target bundleno = 3 (0x3), region = 85 }
 0x371   :  { %1951 = vsyncpa [#allocation7], 1 }
 0x372   :  { %1953 = vsyncpa [#allocation7 + $0x1], 1 }

</bundles_post_ra>
